<compile_context>
chip_gen: v7x
topology: tpu7x:2x2x1
jax: 0.10.0
libtpu: 0.0.40
codegen_flags: <defaults>
</compile_context>

<pallas_src>
import functools

import jax
import jax.numpy as jnp
from jax import lax
from jax.experimental import pallas as pl
from jax.experimental.pallas import tpu as pltpu


# ----------------------------- Pallas kernel ------------------------------ #
def _bilstm_kernel(lens_ref, emb_f_ref, emb_b_ref, w_ih_ref, w_hh_ref, b_ref,
                   out_f_ref, out_b_ref, hfin_ref, cfin_ref,
                   gxf_sc, gxb_sc, h_sc, c_sc, *, unroll, cdt):
    """One time-chunk grid step of the fused bidirectional masked LSTM.

    lens_ref  : [B, 1]      int32 sequence lengths (padded rows are 0)
    emb_f_ref : [T, B, E]   embedded inputs, forward chunk (time order)
    emb_b_ref : [T, B, E]   embedded inputs, backward chunk (array order)
    w_ih_ref  : [2, E, 4H]  input weights  (gate order i, f, g, o)
    w_hh_ref  : [2, H, 4H]  recurrent weights
    b_ref     : [2, 1, 4H]  bias (f32)
    out_f_ref : [T, B, H]   forward per-step hidden (zeros at padded steps)
    out_b_ref : [T, B, H]   backward per-step hidden
    hfin_ref  : [2, B, H]   final hidden (written on the last chunk)
    cfin_ref  : [2, B, H]   final cell
    gxf/gxb_sc: [T*B, 4H]   f32 chunk-local gates scratch (x @ W_ih + b)
    h_sc/c_sc : [2, B, H]   f32 carried hidden / cell state (VMEM scratch)
    """
    T, B, E = emb_f_ref.shape
    H = h_sc.shape[-1]
    tb = pl.program_id(0)
    nb = pl.num_programs(0)

    # h/c scratch persists across the (sequential, "arbitrary") time-chunk
    # grid; it is reset exactly once on the first chunk.
    @pl.when(tb == 0)
    def _init():
        h_sc[...] = jnp.zeros_like(h_sc)
        c_sc[...] = jnp.zeros_like(c_sc)

    # ---- fused input projection: one MXU matmul per direction per chunk ----
    ef = emb_f_ref[...].reshape(T * B, E)
    eb = emb_b_ref[...].reshape(T * B, E)
    gxf_sc[...] = jnp.dot(ef, w_ih_ref[0],
                          preferred_element_type=jnp.float32) + b_ref[0]
    gxb_sc[...] = jnp.dot(eb, w_ih_ref[1],
                          preferred_element_type=jnp.float32) + b_ref[1]

    lens = lens_ref[...]                       # [B, 1] int32
    t0_f = tb * T                              # first global timestep, fwd chunk
    t0_b = (nb - 1 - tb) * T                   # first global timestep, bwd chunk

    def lstm_cell(gates, c):
        # NOTE: with H a multiple of 128 these slices are free vreg views.
        i_g = jax.nn.sigmoid(gates[:, 0:H])
        f_g = jax.nn.sigmoid(gates[:, H:2 * H])
        g_g = jnp.tanh(gates[:, 2 * H:3 * H])
        o_g = jax.nn.sigmoid(gates[:, 3 * H:4 * H])
        c_new = f_g * c + i_g * g_g
        h_new = o_g * jnp.tanh(c_new)
        return h_new, c_new

    def step(i, carry):
        jf = i                                 # forward row, static +1 stride
        jb = T - 1 - i                         # backward row, static -1 stride
        row_f = pl.multiple_of(jf * B, B)      # sublane-aligned scratch offsets
        row_b = pl.multiple_of(jb * B, B)

        hf = h_sc[0]
        cf = c_sc[0]
        hb = h_sc[1]
        cb = c_sc[1]

        # Two independent dependency chains -> the scheduler interleaves the
        # fwd/bwd MXU pushes with the other direction's EUP nonlinearities.
        gf = gxf_sc[pl.ds(row_f, B), :] + jnp.dot(
            hf.astype(cdt), w_hh_ref[0], preferred_element_type=jnp.float32)
        gb = gxb_sc[pl.ds(row_b, B), :] + jnp.dot(
            hb.astype(cdt), w_hh_ref[1], preferred_element_type=jnp.float32)

        hf_new, cf_new = lstm_cell(gf, cf)
        hb_new, cb_new = lstm_cell(gb, cb)

        # pack_padded semantics: freeze state past each sequence's length;
        # pad_packed pads outputs with zeros.  The backward direction relies on
        # the initial h/c being exactly zero until its first valid timestep.
        mf = (t0_f + jf) < lens                # [B, 1] bool
        mb = (t0_b + jb) < lens

        h_sc[0] = jnp.where(mf, hf_new, hf)
        c_sc[0] = jnp.where(mf, cf_new, cf)
        h_sc[1] = jnp.where(mb, hb_new, hb)
        c_sc[1] = jnp.where(mb, cb_new, cb)

        out_f_ref[jf] = jnp.where(mf, hf_new, 0.0).astype(out_f_ref.dtype)
        out_b_ref[jb] = jnp.where(mb, hb_new, 0.0).astype(out_b_ref.dtype)
        return carry

    lax.fori_loop(0, T, step, 0, unroll=unroll)

    # hfin/cfin have a constant block index -> kept resident in VMEM across the
    # whole grid and written back to HBM once, after the last chunk.
    @pl.when(tb == nb - 1)
    def _finalize():
        hfin_ref[...] = h_sc[...].astype(hfin_ref.dtype)
        cfin_ref[...] = c_sc[...].astype(cfin_ref.dtype)


def _run_bilstm(lens2d, emb, w_ih, w_hh, bias, *, time_block, unroll,
                vmem_limit_bytes):
    """emb: [S_pad, B_pad, E] (compute dtype); weights: [2, E|H, 4H]; bias f32.

    Returns out_f/out_b [S_pad, B_pad, H] (f32), h_n/c_n [2, B_pad, H] (f32).
    """
    S_pad, B, E = emb.shape
    D, H, G = w_hh.shape
    assert G == 4 * H and D == 2
    T = time_block
    assert S_pad % T == 0
    nb = S_pad // T

    out_shapes = (
        jax.ShapeDtypeStruct((S_pad, B, H), jnp.float32),   # forward outputs
        jax.ShapeDtypeStruct((S_pad, B, H), jnp.float32),   # backward outputs
        jax.ShapeDtypeStruct((D, B, H), jnp.float32),       # h_n
        jax.ShapeDtypeStruct((D, B, H), jnp.float32),       # c_n
    )
    in_specs = [
        pl.BlockSpec((B, 1), lambda t: (0, 0)),                   # lengths
        pl.BlockSpec((T, B, E), lambda t: (t, 0, 0)),             # emb, fwd chunk
        pl.BlockSpec((T, B, E), lambda t: (nb - 1 - t, 0, 0)),    # emb, bwd chunk
        pl.BlockSpec((D, E, G), lambda t: (0, 0, 0)),             # W_ih
        pl.BlockSpec((D, H, G), lambda t: (0, 0, 0)),             # W_hh
        pl.BlockSpec((D, 1, G), lambda t: (0, 0, 0)),             # bias
    ]
    out_specs = (
        pl.BlockSpec((T, B, H), lambda t: (t, 0, 0)),             # out fwd
        pl.BlockSpec((T, B, H), lambda t: (nb - 1 - t, 0, 0)),    # out bwd
        pl.BlockSpec((D, B, H), lambda t: (0, 0, 0)),             # h_n
        pl.BlockSpec((D, B, H), lambda t: (0, 0, 0)),             # c_n
    )
    kernel = functools.partial(_bilstm_kernel, unroll=unroll, cdt=w_hh.dtype)
    return pl.pallas_call(
        kernel,
        out_shape=out_shapes,
        grid=(nb,),
        in_specs=in_specs,
        out_specs=out_specs,
        scratch_shapes=[pltpu.VMEM((T * B, G), jnp.float32),      # fwd gates
                        pltpu.VMEM((T * B, G), jnp.float32),      # bwd gates
                        pltpu.VMEM((D, B, H), jnp.float32),       # h carry
                        pltpu.VMEM((D, B, H), jnp.float32)],      # c carry
        compiler_params=pltpu.CompilerParams(
            dimension_semantics=("arbitrary",),                   # carried state
            vmem_limit_bytes=vmem_limit_bytes),
    )(lens2d, emb, emb, w_ih, w_hh, bias)


# ------------------------------ module glue -------------------------------- #
def init_params(key, vocab_size, emb_dim, hidden_size, bidirectional=True):
    num_dirs = 2 if bidirectional else 1
    assert hidden_size % num_dirs == 0
    H = hidden_size // num_dirs
    k_emb, k_ih, k_hh, k_b = jax.random.split(key, 4)
    scale = 1.0 / jnp.sqrt(H)
    return {
        "embedding": jax.random.normal(k_emb, (vocab_size, emb_dim),
                                       jnp.float32) * 0.1,
        # stored transposed: [D, E, 4H] / [D, H, 4H] / [D, 1, 4H], gates i,f,g,o
        "w_ih_t": jax.random.uniform(k_ih, (num_dirs, emb_dim, 4 * H),
                                     jnp.float32, -scale, scale),
        "w_hh_t": jax.random.uniform(k_hh, (num_dirs, H, 4 * H),
                                     jnp.float32, -scale, scale),
        "bias": jax.random.uniform(k_b, (num_dirs, 1, 4 * H),
                                   jnp.float32, -scale, scale),
    }


@functools.partial(jax.jit, static_argnames=("time_block", "compute_dtype"))
def rnn_encoder_forward(src, lengths, embedding, w_ih_t, w_hh_t, bias,
                        time_block=256, compute_dtype=jnp.float32):
    """src: int32 [S, B]; lengths: int32 [B].

    The length sort / unsort of the PyTorch forward only exists to satisfy
    pack_padded_sequence and cancels out; per-sequence length masking inside
    the kernel reproduces the same math.
    """
    S, B = src.shape
    D, E, G = w_ih_t.shape
    H = G // 4
    assert D == 2   # TODO(synk): unidirectional / stacked variants not implemented

    itemsize = jnp.dtype(compute_dtype).itemsize
    B_pad = -(-B // 8) * 8                      # sublane-aligned batch

    # VMEM estimate for one grid step (double-buffered streamed blocks +
    # persistent scratch); used to size T against a v7x-safe budget and to set
    # vmem_limit_bytes explicitly.
    def _vmem_est(t):
        emb_blk = 2 * 2 * t * B_pad * E * itemsize          # 2 dirs x dbl-buffer
        w_blk = 2 * (E * G + H * G) * itemsize + 2 * G * 4  # W_ih + W_hh + bias
        out_blk = 2 * 2 * t * B_pad * H * 4
        fin_blk = 2 * 2 * 2 * B_pad * H * 4
        scratch = 2 * t * B_pad * G * 4 + 2 * 2 * B_pad * H * 4
        return emb_blk + w_blk + out_blk + fin_blk + scratch + 4096

    T = max(1, min(time_block, S))
    budget = 40 * 2 ** 20                       # leaves headroom on v7x (64 MiB)
    while T > 8 and _vmem_est(T) > budget:
        T //= 2
    S_pad = -(-S // T) * T
    vmem_limit = int(min(64 * 2 ** 20, max(16 * 2 ** 20, 2 * _vmem_est(T))))

    # unroll sized by a vreg budget: gates per step per direction in f32 vregs.
    gate_vregs = max(1, (B_pad * G) // 1024)
    unroll = int(max(1, min(T, 8, 16 // (2 * gate_vregs))))

    emb = embedding[src].astype(compute_dtype)              # [S, B, E]
    if (S_pad, B_pad) != (S, B):
        # padded rows/timesteps are masked out by the in-kernel length test
        emb = jnp.pad(emb, ((0, S_pad - S), (0, B_pad - B), (0, 0)))
    lens2d = jnp.zeros((B_pad, 1), jnp.int32).at[:B, 0].set(
        lengths.astype(jnp.int32))

    out_f, out_b, h_n, c_n = _run_bilstm(
        lens2d, emb,
        w_ih_t.astype(compute_dtype), w_hh_t.astype(compute_dtype),
        bias.astype(jnp.float32),
        time_block=T, unroll=unroll, vmem_limit_bytes=vmem_limit)

    memory_bank = jnp.concatenate([out_f[:S, :B], out_b[:S, :B]], axis=-1)
    return (h_n[:, :B], c_n[:, :B]), memory_bank


# ------------------------- pure-JAX reference ------------------------------ #
def rnn_encoder_reference(src, lengths, embedding, w_ih_t, w_hh_t, bias):
    S, B = src.shape
    D, _, G = w_ih_t.shape
    H = G // 4
    emb = embedding[src]
    gx = (jnp.einsum("sbe,deg->dsbg", emb, w_ih_t,
                     preferred_element_type=jnp.float32,
                     precision=lax.Precision.HIGHEST) + bias[:, None])
    mask = (jnp.arange(S)[:, None] < lengths[None, :])[:, :, None]   # [S,B,1]

    def run(gx_dir, msk, whh):
        def step(carry, inp):
            h, c = carry
            xg, m = inp
            gates = xg + jnp.dot(h, whh, precision=lax.Precision.HIGHEST)
            i = jax.nn.sigmoid(gates[:, :H])
            f = jax.nn.sigmoid(gates[:, H:2 * H])
            g = jnp.tanh(gates[:, 2 * H:3 * H])
            o = jax.nn.sigmoid(gates[:, 3 * H:])
            c_new = f * c + i * g
            h_new = o * jnp.tanh(c_new)
            return ((jnp.where(m, h_new, h), jnp.where(m, c_new, c)),
                    jnp.where(m, h_new, 0.0))
        init = (jnp.zeros((B, H), jnp.float32), jnp.zeros((B, H), jnp.float32))
        (hf, cf), outs = lax.scan(step, init, (gx_dir, msk))
        return outs, hf, cf

    outs, hs, cs = [], [], []
    for dd in range(D):
        if dd == 0:
            o, hf, cf = run(gx[dd], mask, w_hh_t[dd])
        else:
            o_r, hf, cf = run(jnp.flip(gx[dd], 0), jnp.flip(mask, 0),
                              w_hh_t[dd])
            o = jnp.flip(o_r, 0)
        outs.append(o); hs.append(hf); cs.append(cf)
    return (jnp.stack(hs), jnp.stack(cs)), jnp.concatenate(outs, axis=-1)


if __name__ == "__main__":
    # small deterministic problem: LSTM, bidirectional, num_layers = 1
    S, B = 8, 2
    VOCAB, EMB_DIM, HIDDEN = 20, 32, 64       # per-direction H = 32, 4H = 128

    key = jax.random.PRNGKey(0)
    k_src, k_params = jax.random.split(key)
    src = jax.random.randint(k_src, (S, B), 0, VOCAB, dtype=jnp.int32)
    lengths = jnp.array([8, 5], dtype=jnp.int32)

    params = init_params(k_params, VOCAB, EMB_DIM, HIDDEN, bidirectional=True)

    # f32 path, time_block=4 -> two chunks, exercises the carried-state path.
    (h_n, c_n), memory_bank = rnn_encoder_forward(
        src, lengths, params["embedding"], params["w_ih_t"],
        params["w_hh_t"], params["bias"], time_block=4)
    jax.block_until_ready((h_n, c_n, memory_bank))

    # shape checks (PyTorch: memory_bank [S,B,hidden], h_n/c_n [dirs,B,hidden/dirs])
    assert memory_bank.shape == (S, B, HIDDEN)
    assert h_n.shape == (2, B, HIDDEN // 2) and c_n.shape == (2, B, HIDDEN // 2)
    # pad_packed semantics: outputs past each sequence's length are exactly zero
    assert float(jnp.abs(memory_bank[5:, 1, :]).max()) == 0.0

    # numeric check against a pure-JAX lax.scan reference (HIGHEST-precision
    # matmuls); exact bit-match is not expected since Mosaic's and XLA's f32
    # matmul pass structures differ.
    (h_ref, c_ref), mem_ref = rnn_encoder_reference(
        src, lengths, params["embedding"], params["w_ih_t"],
        params["w_hh_t"], params["bias"])
    tol = 2e-3
    assert float(jnp.abs(memory_bank - mem_ref).max()) < tol
    assert float(jnp.abs(h_n - h_ref).max()) < tol
    assert float(jnp.abs(c_n - c_ref).max()) < tol

    # bf16 MXU-operand path (f32 accumulation / f32 gating), looser tolerance.
    (h_bf, c_bf), mem_bf = rnn_encoder_forward(
        src, lengths, params["embedding"], params["w_ih_t"],
        params["w_hh_t"], params["bias"], time_block=4,
        compute_dtype=jnp.bfloat16)
    jax.block_until_ready((h_bf, c_bf, mem_bf))
    assert float(jnp.abs(mem_bf - mem_ref).max()) < 5e-2
    assert float(jnp.abs(h_bf - h_ref).max()) < 5e-2
    assert float(jnp.abs(c_bf - c_ref).max()) < 5e-2

    print("KERNEL_OK")
</pallas_src>

<mosaic_0001>
module attributes {stable_mosaic.version = 11 : i64} {
  func.func @_bilstm_kernel(%arg0: i32, %arg1: memref<8x1xi32, #tpu.memory_space<vmem>>, %arg2: memref<4x8x32xf32, #tpu.memory_space<vmem>>, %arg3: memref<4x8x32xf32, #tpu.memory_space<vmem>>, %arg4: memref<2x32x128xf32, #tpu.memory_space<vmem>>, %arg5: memref<2x32x128xf32, #tpu.memory_space<vmem>>, %arg6: memref<2x1x128xf32, #tpu.memory_space<vmem>>, %arg7: memref<4x8x32xf32, #tpu.memory_space<vmem>>, %arg8: memref<4x8x32xf32, #tpu.memory_space<vmem>>, %arg9: memref<2x8x32xf32, #tpu.memory_space<vmem>>, %arg10: memref<2x8x32xf32, #tpu.memory_space<vmem>>, %arg11: memref<32x128xf32, #tpu.memory_space<vmem>>, %arg12: memref<32x128xf32, #tpu.memory_space<vmem>>, %arg13: memref<2x8x32xf32, #tpu.memory_space<vmem>>, %arg14: memref<2x8x32xf32, #tpu.memory_space<vmem>>) attributes {dimension_semantics = [#tpu.dimension_semantics<arbitrary>], iteration_bounds = array<i64: 2>, scalar_prefetch = 0 : i64, scratch_operands = 4 : i64, tpu.core_type = #tpu.core_type<tc>, window_params = [{pipeline_mode = #tpu.pipeline_mode<synchronous>, transform_indices = @transform_0, window_bounds = array<i64: 8, 1>}, {transform_indices = @transform_1, window_bounds = array<i64: 4, 8, 32>}, {transform_indices = @transform_2, window_bounds = array<i64: 4, 8, 32>}, {pipeline_mode = #tpu.pipeline_mode<synchronous>, transform_indices = @transform_3, window_bounds = array<i64: 2, 32, 128>}, {pipeline_mode = #tpu.pipeline_mode<synchronous>, transform_indices = @transform_4, window_bounds = array<i64: 2, 32, 128>}, {pipeline_mode = #tpu.pipeline_mode<synchronous>, transform_indices = @transform_5, window_bounds = array<i64: 2, 1, 128>}, {transform_indices = @transform_6, window_bounds = array<i64: 4, 8, 32>}, {transform_indices = @transform_7, window_bounds = array<i64: 4, 8, 32>}, {pipeline_mode = #tpu.pipeline_mode<synchronous>, transform_indices = @transform_8, window_bounds = array<i64: 2, 8, 32>}, {pipeline_mode = #tpu.pipeline_mode<synchronous>, transform_indices = @transform_9, window_bounds = array<i64: 2, 8, 32>}]} {
    %c0_i32 = arith.constant 0 : i32
    %0 = arith.cmpi eq, %arg0, %c0_i32 : i32
    %1 = arith.extui %0 : i1 to i32
    %c0_i32_0 = arith.constant 0 : i32
    %2 = arith.cmpi ne, %1, %c0_i32_0 : i32
    scf.if %2 {
      %cst_225 = arith.constant 0.000000e+00 : f32
      %514 = vector.broadcast %cst_225 : f32 to vector<2x8x32xf32>
      %c0_226 = arith.constant 0 : index
      %c0_227 = arith.constant 0 : index
      %c0_228 = arith.constant 0 : index
      %515 = vector.load %arg13[%c0_226, %c0_227, %c0_228] : memref<2x8x32xf32, #tpu.memory_space<vmem>>, vector<2x8x32xf32>
      tpu.vector_store %arg13[%c0_226, %c0_227, %c0_228], %514 {strides = array<i32>} : memref<2x8x32xf32, #tpu.memory_space<vmem>>, vector<2x8x32xf32>,
      %cst_229 = arith.constant 0.000000e+00 : f32
      %516 = vector.broadcast %cst_229 : f32 to vector<2x8x32xf32>
      %c0_230 = arith.constant 0 : index
      %c0_231 = arith.constant 0 : index
      %c0_232 = arith.constant 0 : index
      %517 = vector.load %arg14[%c0_230, %c0_231, %c0_232] : memref<2x8x32xf32, #tpu.memory_space<vmem>>, vector<2x8x32xf32>
      tpu.vector_store %arg14[%c0_230, %c0_231, %c0_232], %516 {strides = array<i32>} : memref<2x8x32xf32, #tpu.memory_space<vmem>>, vector<2x8x32xf32>,
    } else {
    }
    %c0 = arith.constant 0 : index
    %c0_1 = arith.constant 0 : index
    %c0_2 = arith.constant 0 : index
    %3 = vector.load %arg2[%c0, %c0_1, %c0_2] : memref<4x8x32xf32, #tpu.memory_space<vmem>>, vector<4x8x32xf32>
    %4 = vector.shape_cast %3 : vector<4x8x32xf32> to vector<32x32xf32>
    %c0_3 = arith.constant 0 : index
    %c0_4 = arith.constant 0 : index
    %c0_5 = arith.constant 0 : index
    %5 = vector.load %arg3[%c0_3, %c0_4, %c0_5] : memref<4x8x32xf32, #tpu.memory_space<vmem>>, vector<4x8x32xf32>
    %6 = vector.shape_cast %5 : vector<4x8x32xf32> to vector<32x32xf32>
    %c0_6 = arith.constant 0 : index
    %c0_7 = arith.constant 0 : index
    %c0_8 = arith.constant 0 : index
    %7 = vector.load %arg4[%c0_6, %c0_7, %c0_8] : memref<2x32x128xf32, #tpu.memory_space<vmem>>, vector<1x32x128xf32>
    %8 = vector.shape_cast %7 : vector<1x32x128xf32> to vector<32x128xf32>
    %cst = arith.constant dense<0.000000e+00> : vector<32x128xf32>
    %9 = tpu.matmul %4, %8, %cst {dimension_numbers = #tpu.dot_dimension_numbers<[1], [0], [0], [1], [0, 0, 1, 1], [], []>} : vector<32x32xf32>, vector<32x128xf32>, vector<32x128xf32> -> vector<32x128xf32>
    %c0_9 = arith.constant 0 : index
    %c0_10 = arith.constant 0 : index
    %c0_11 = arith.constant 0 : index
    %10 = vector.load %arg6[%c0_9, %c0_10, %c0_11] : memref<2x1x128xf32, #tpu.memory_space<vmem>>, vector<1x1x128xf32>
    %11 = vector.shape_cast %10 : vector<1x1x128xf32> to vector<1x128xf32>
    %12 = vector.broadcast %11 : vector<1x128xf32> to vector<32x128xf32>
    %13 = arith.addf %9, %12 : vector<32x128xf32>
    %c0_12 = arith.constant 0 : index
    %c0_13 = arith.constant 0 : index
    %14 = vector.load %arg11[%c0_12, %c0_13] : memref<32x128xf32, #tpu.memory_space<vmem>>, vector<32x128xf32>
    tpu.vector_store %arg11[%c0_12, %c0_13], %13 {strides = array<i32>} : memref<32x128xf32, #tpu.memory_space<vmem>>, vector<32x128xf32>,
    %c1 = arith.constant 1 : index
    %c0_14 = arith.constant 0 : index
    %c0_15 = arith.constant 0 : index
    %15 = vector.load %arg4[%c1, %c0_14, %c0_15] : memref<2x32x128xf32, #tpu.memory_space<vmem>>, vector<1x32x128xf32>
    %16 = vector.shape_cast %15 : vector<1x32x128xf32> to vector<32x128xf32>
    %cst_16 = arith.constant dense<0.000000e+00> : vector<32x128xf32>
    %17 = tpu.matmul %6, %16, %cst_16 {dimension_numbers = #tpu.dot_dimension_numbers<[1], [0], [0], [1], [0, 0, 1, 1], [], []>} : vector<32x32xf32>, vector<32x128xf32>, vector<32x128xf32> -> vector<32x128xf32>
    %c1_17 = arith.constant 1 : index
    %c0_18 = arith.constant 0 : index
    %c0_19 = arith.constant 0 : index
    %18 = vector.load %arg6[%c1_17, %c0_18, %c0_19] : memref<2x1x128xf32, #tpu.memory_space<vmem>>, vector<1x1x128xf32>
    %19 = vector.shape_cast %18 : vector<1x1x128xf32> to vector<1x128xf32>
    %20 = vector.broadcast %19 : vector<1x128xf32> to vector<32x128xf32>
    %21 = arith.addf %17, %20 : vector<32x128xf32>
    %c0_20 = arith.constant 0 : index
    %c0_21 = arith.constant 0 : index
    %22 = vector.load %arg12[%c0_20, %c0_21] : memref<32x128xf32, #tpu.memory_space<vmem>>, vector<32x128xf32>
    tpu.vector_store %arg12[%c0_20, %c0_21], %21 {strides = array<i32>} : memref<32x128xf32, #tpu.memory_space<vmem>>, vector<32x128xf32>,
    %c0_22 = arith.constant 0 : index
    %c0_23 = arith.constant 0 : index
    %23 = vector.load %arg1[%c0_22, %c0_23] : memref<8x1xi32, #tpu.memory_space<vmem>>, vector<8x1xi32>
    %c4_i32 = arith.constant 4 : i32
    %24 = arith.muli %arg0, %c4_i32 : i32
    %c1_i32 = arith.constant 1 : i32
    %25 = arith.subi %c1_i32, %arg0 : i32
    %c4_i32_24 = arith.constant 4 : i32
    %26 = arith.muli %25, %c4_i32_24 : i32
    %c0_i32_25 = arith.constant 0 : i32
    %c3_i32 = arith.constant 3 : i32
    %27 = arith.subi %c3_i32, %c0_i32_25 : i32
    %c8_i32 = arith.constant 8 : i32
    %28 = arith.muli %c0_i32_25, %c8_i32 : i32
    %29 = tpu.assume_multiple %28, 8 : i32
    %c8_i32_26 = arith.constant 8 : i32
    %30 = arith.muli %27, %c8_i32_26 : i32
    %31 = tpu.assume_multiple %30, 8 : i32
    %c0_27 = arith.constant 0 : index
    %c0_28 = arith.constant 0 : index
    %c0_29 = arith.constant 0 : index
    %32 = vector.load %arg13[%c0_27, %c0_28, %c0_29] : memref<2x8x32xf32, #tpu.memory_space<vmem>>, vector<1x8x32xf32>
    %33 = vector.shape_cast %32 : vector<1x8x32xf32> to vector<8x32xf32>
    %c0_30 = arith.constant 0 : index
    %c0_31 = arith.constant 0 : index
    %c0_32 = arith.constant 0 : index
    %34 = vector.load %arg14[%c0_30, %c0_31, %c0_32] : memref<2x8x32xf32, #tpu.memory_space<vmem>>, vector<1x8x32xf32>
    %35 = vector.shape_cast %34 : vector<1x8x32xf32> to vector<8x32xf32>
    %c1_33 = arith.constant 1 : index
    %c0_34 = arith.constant 0 : index
    %c0_35 = arith.constant 0 : index
    %36 = vector.load %arg13[%c1_33, %c0_34, %c0_35] : memref<2x8x32xf32, #tpu.memory_space<vmem>>, vector<1x8x32xf32>
    %37 = vector.shape_cast %36 : vector<1x8x32xf32> to vector<8x32xf32>
    %c1_36 = arith.constant 1 : index
    %c0_37 = arith.constant 0 : index
    %c0_38 = arith.constant 0 : index
    %38 = vector.load %arg14[%c1_36, %c0_37, %c0_38] : memref<2x8x32xf32, #tpu.memory_space<vmem>>, vector<1x8x32xf32>
    %39 = vector.shape_cast %38 : vector<1x8x32xf32> to vector<8x32xf32>
    %40 = arith.index_cast %29 : i32 to index
    %c0_39 = arith.constant 0 : index
    %41 = vector.load %arg11[%40, %c0_39] : memref<32x128xf32, #tpu.memory_space<vmem>>, vector<8x128xf32>
    %c0_40 = arith.constant 0 : index
    %c0_41 = arith.constant 0 : index
    %c0_42 = arith.constant 0 : index
    %42 = vector.load %arg5[%c0_40, %c0_41, %c0_42] : memref<2x32x128xf32, #tpu.memory_space<vmem>>, vector<1x32x128xf32>
    %43 = vector.shape_cast %42 : vector<1x32x128xf32> to vector<32x128xf32>
    %cst_43 = arith.constant dense<0.000000e+00> : vector<8x128xf32>
    %44 = tpu.matmul %33, %43, %cst_43 {dimension_numbers = #tpu.dot_dimension_numbers<[1], [0], [0], [1], [0, 0, 1, 1], [], []>} : vector<8x32xf32>, vector<32x128xf32>, vector<8x128xf32> -> vector<8x128xf32>
    %45 = arith.addf %41, %44 : vector<8x128xf32>
    %46 = arith.index_cast %31 : i32 to index
    %c0_44 = arith.constant 0 : index
    %47 = vector.load %arg12[%46, %c0_44] : memref<32x128xf32, #tpu.memory_space<vmem>>, vector<8x128xf32>
    %c1_45 = arith.constant 1 : index
    %c0_46 = arith.constant 0 : index
    %c0_47 = arith.constant 0 : index
    %48 = vector.load %arg5[%c1_45, %c0_46, %c0_47] : memref<2x32x128xf32, #tpu.memory_space<vmem>>, vector<1x32x128xf32>
    %49 = vector.shape_cast %48 : vector<1x32x128xf32> to vector<32x128xf32>
    %cst_48 = arith.constant dense<0.000000e+00> : vector<8x128xf32>
    %50 = tpu.matmul %37, %49, %cst_48 {dimension_numbers = #tpu.dot_dimension_numbers<[1], [0], [0], [1], [0, 0, 1, 1], [], []>} : vector<8x32xf32>, vector<32x128xf32>, vector<8x128xf32> -> vector<8x128xf32>
    %51 = arith.addf %47, %50 : vector<8x128xf32>
    %52 = vector.extract_strided_slice %45 {offsets = [0, 0], sizes = [8, 32], strides = [1, 1]} : vector<8x128xf32> to vector<8x32xf32>
    %53 = arith.negf %52 : vector<8x32xf32>
    %54 = math.exp %53 : vector<8x32xf32>
    %cst_49 = arith.constant 1.000000e+00 : f32
    %55 = vector.broadcast %cst_49 : f32 to vector<8x32xf32>
    %56 = arith.addf %55, %54 : vector<8x32xf32>
    %57 = arith.divf %55, %56 : vector<8x32xf32>
    %58 = vector.extract_strided_slice %45 {offsets = [0, 32], sizes = [8, 32], strides = [1, 1]} : vector<8x128xf32> to vector<8x32xf32>
    %59 = arith.negf %58 : vector<8x32xf32>
    %60 = math.exp %59 : vector<8x32xf32>
    %cst_50 = arith.constant 1.000000e+00 : f32
    %61 = vector.broadcast %cst_50 : f32 to vector<8x32xf32>
    %62 = arith.addf %61, %60 : vector<8x32xf32>
    %63 = arith.divf %61, %62 : vector<8x32xf32>
    %64 = vector.extract_strided_slice %45 {offsets = [0, 64], sizes = [8, 32], strides = [1, 1]} : vector<8x128xf32> to vector<8x32xf32>
    %65 = math.tanh %64 : vector<8x32xf32>
    %66 = vector.extract_strided_slice %45 {offsets = [0, 96], sizes = [8, 32], strides = [1, 1]} : vector<8x128xf32> to vector<8x32xf32>
    %67 = arith.negf %66 : vector<8x32xf32>
    %68 = math.exp %67 : vector<8x32xf32>
    %cst_51 = arith.constant 1.000000e+00 : f32
    %69 = vector.broadcast %cst_51 : f32 to vector<8x32xf32>
    %70 = arith.addf %69, %68 : vector<8x32xf32>
    %71 = arith.divf %69, %70 : vector<8x32xf32>
    %72 = arith.mulf %63, %35 : vector<8x32xf32>
    %73 = arith.mulf %57, %65 : vector<8x32xf32>
    %74 = arith.addf %72, %73 : vector<8x32xf32>
    %75 = math.tanh %74 : vector<8x32xf32>
    %76 = arith.mulf %71, %75 : vector<8x32xf32>
    %77 = vector.extract_strided_slice %51 {offsets = [0, 0], sizes = [8, 32], strides = [1, 1]} : vector<8x128xf32> to vector<8x32xf32>
    %78 = arith.negf %77 : vector<8x32xf32>
    %79 = math.exp %78 : vector<8x32xf32>
    %cst_52 = arith.constant 1.000000e+00 : f32
    %80 = vector.broadcast %cst_52 : f32 to vector<8x32xf32>
    %81 = arith.addf %80, %79 : vector<8x32xf32>
    %82 = arith.divf %80, %81 : vector<8x32xf32>
    %83 = vector.extract_strided_slice %51 {offsets = [0, 32], sizes = [8, 32], strides = [1, 1]} : vector<8x128xf32> to vector<8x32xf32>
    %84 = arith.negf %83 : vector<8x32xf32>
    %85 = math.exp %84 : vector<8x32xf32>
    %cst_53 = arith.constant 1.000000e+00 : f32
    %86 = vector.broadcast %cst_53 : f32 to vector<8x32xf32>
    %87 = arith.addf %86, %85 : vector<8x32xf32>
    %88 = arith.divf %86, %87 : vector<8x32xf32>
    %89 = vector.extract_strided_slice %51 {offsets = [0, 64], sizes = [8, 32], strides = [1, 1]} : vector<8x128xf32> to vector<8x32xf32>
    %90 = math.tanh %89 : vector<8x32xf32>
    %91 = vector.extract_strided_slice %51 {offsets = [0, 96], sizes = [8, 32], strides = [1, 1]} : vector<8x128xf32> to vector<8x32xf32>
    %92 = arith.negf %91 : vector<8x32xf32>
    %93 = math.exp %92 : vector<8x32xf32>
    %cst_54 = arith.constant 1.000000e+00 : f32
    %94 = vector.broadcast %cst_54 : f32 to vector<8x32xf32>
    %95 = arith.addf %94, %93 : vector<8x32xf32>
    %96 = arith.divf %94, %95 : vector<8x32xf32>
    %97 = arith.mulf %88, %39 : vector<8x32xf32>
    %98 = arith.mulf %82, %90 : vector<8x32xf32>
    %99 = arith.addf %97, %98 : vector<8x32xf32>
    %100 = math.tanh %99 : vector<8x32xf32>
    %101 = arith.mulf %96, %100 : vector<8x32xf32>
    %102 = arith.addi %24, %c0_i32_25 : i32
    %103 = vector.broadcast %102 : i32 to vector<8x1xi32>
    %104 = arith.cmpi slt, %103, %23 : vector<8x1xi32>
    %105 = arith.addi %26, %27 : i32
    %106 = vector.broadcast %105 : i32 to vector<8x1xi32>
    %107 = arith.cmpi slt, %106, %23 : vector<8x1xi32>
    %108 = vector.shape_cast %104 : vector<8x1xi1> to vector<8x1xi1>
    %109 = vector.broadcast %108 : vector<8x1xi1> to vector<8x32xi1>
    %110 = arith.select %109, %76, %33 : vector<8x32xi1>, vector<8x32xf32>
    %c0_55 = arith.constant 0 : index
    %c0_56 = arith.constant 0 : index
    %c0_57 = arith.constant 0 : index
    %111 = vector.load %arg13[%c0_55, %c0_56, %c0_57] : memref<2x8x32xf32, #tpu.memory_space<vmem>>, vector<1x8x32xf32>
    %112 = vector.shape_cast %111 : vector<1x8x32xf32> to vector<8x32xf32>
    %113 = vector.shape_cast %110 : vector<8x32xf32> to vector<1x8x32xf32>
    tpu.vector_store %arg13[%c0_55, %c0_56, %c0_57], %113 {strides = array<i32>} : memref<2x8x32xf32, #tpu.memory_space<vmem>>, vector<1x8x32xf32>,
    %114 = vector.shape_cast %104 : vector<8x1xi1> to vector<8x1xi1>
    %115 = vector.broadcast %114 : vector<8x1xi1> to vector<8x32xi1>
    %116 = arith.select %115, %74, %35 : vector<8x32xi1>, vector<8x32xf32>
    %c0_58 = arith.constant 0 : index
    %c0_59 = arith.constant 0 : index
    %c0_60 = arith.constant 0 : index
    %117 = vector.load %arg14[%c0_58, %c0_59, %c0_60] : memref<2x8x32xf32, #tpu.memory_space<vmem>>, vector<1x8x32xf32>
    %118 = vector.shape_cast %117 : vector<1x8x32xf32> to vector<8x32xf32>
    %119 = vector.shape_cast %116 : vector<8x32xf32> to vector<1x8x32xf32>
    tpu.vector_store %arg14[%c0_58, %c0_59, %c0_60], %119 {strides = array<i32>} : memref<2x8x32xf32, #tpu.memory_space<vmem>>, vector<1x8x32xf32>,
    %120 = vector.shape_cast %107 : vector<8x1xi1> to vector<8x1xi1>
    %121 = vector.broadcast %120 : vector<8x1xi1> to vector<8x32xi1>
    %122 = arith.select %121, %101, %37 : vector<8x32xi1>, vector<8x32xf32>
    %c1_61 = arith.constant 1 : index
    %c0_62 = arith.constant 0 : index
    %c0_63 = arith.constant 0 : index
    %123 = vector.load %arg13[%c1_61, %c0_62, %c0_63] : memref<2x8x32xf32, #tpu.memory_space<vmem>>, vector<1x8x32xf32>
    %124 = vector.shape_cast %123 : vector<1x8x32xf32> to vector<8x32xf32>
    %125 = vector.shape_cast %122 : vector<8x32xf32> to vector<1x8x32xf32>
    tpu.vector_store %arg13[%c1_61, %c0_62, %c0_63], %125 {strides = array<i32>} : memref<2x8x32xf32, #tpu.memory_space<vmem>>, vector<1x8x32xf32>,
    %126 = vector.shape_cast %107 : vector<8x1xi1> to vector<8x1xi1>
    %127 = vector.broadcast %126 : vector<8x1xi1> to vector<8x32xi1>
    %128 = arith.select %127, %99, %39 : vector<8x32xi1>, vector<8x32xf32>
    %c1_64 = arith.constant 1 : index
    %c0_65 = arith.constant 0 : index
    %c0_66 = arith.constant 0 : index
    %129 = vector.load %arg14[%c1_64, %c0_65, %c0_66] : memref<2x8x32xf32, #tpu.memory_space<vmem>>, vector<1x8x32xf32>
    %130 = vector.shape_cast %129 : vector<1x8x32xf32> to vector<8x32xf32>
    %131 = vector.shape_cast %128 : vector<8x32xf32> to vector<1x8x32xf32>
    tpu.vector_store %arg14[%c1_64, %c0_65, %c0_66], %131 {strides = array<i32>} : memref<2x8x32xf32, #tpu.memory_space<vmem>>, vector<1x8x32xf32>,
    %cst_67 = arith.constant 0.000000e+00 : f32
    %132 = vector.shape_cast %104 : vector<8x1xi1> to vector<8x1xi1>
    %133 = vector.broadcast %132 : vector<8x1xi1> to vector<8x32xi1>
    %134 = vector.broadcast %cst_67 : f32 to vector<8x32xf32>
    %135 = arith.select %133, %76, %134 : vector<8x32xi1>, vector<8x32xf32>
    %136 = arith.index_cast %c0_i32_25 : i32 to index
    %c0_68 = arith.constant 0 : index
    %c0_69 = arith.constant 0 : index
    %137 = vector.load %arg7[%136, %c0_68, %c0_69] : memref<4x8x32xf32, #tpu.memory_space<vmem>>, vector<1x8x32xf32>
    %138 = vector.shape_cast %137 : vector<1x8x32xf32> to vector<8x32xf32>
    %139 = vector.shape_cast %135 : vector<8x32xf32> to vector<1x8x32xf32>
    tpu.vector_store %arg7[%136, %c0_68, %c0_69], %139 {strides = array<i32>} : memref<4x8x32xf32, #tpu.memory_space<vmem>>, vector<1x8x32xf32>,
    %cst_70 = arith.constant 0.000000e+00 : f32
    %140 = vector.shape_cast %107 : vector<8x1xi1> to vector<8x1xi1>
    %141 = vector.broadcast %140 : vector<8x1xi1> to vector<8x32xi1>
    %142 = vector.broadcast %cst_70 : f32 to vector<8x32xf32>
    %143 = arith.select %141, %101, %142 : vector<8x32xi1>, vector<8x32xf32>
    %144 = arith.index_cast %27 : i32 to index
    %c0_71 = arith.constant 0 : index
    %c0_72 = arith.constant 0 : index
    %145 = vector.load %arg8[%144, %c0_71, %c0_72] : memref<4x8x32xf32, #tpu.memory_space<vmem>>, vector<1x8x32xf32>
    %146 = vector.shape_cast %145 : vector<1x8x32xf32> to vector<8x32xf32>
    %147 = vector.shape_cast %143 : vector<8x32xf32> to vector<1x8x32xf32>
    tpu.vector_store %arg8[%144, %c0_71, %c0_72], %147 {strides = array<i32>} : memref<4x8x32xf32, #tpu.memory_space<vmem>>, vector<1x8x32xf32>,
    %c1_i32_73 = arith.constant 1 : i32
    %c3_i32_74 = arith.constant 3 : i32
    %148 = arith.subi %c3_i32_74, %c1_i32_73 : i32
    %c8_i32_75 = arith.constant 8 : i32
    %149 = arith.muli %c1_i32_73, %c8_i32_75 : i32
    %150 = tpu.assume_multiple %149, 8 : i32
    %c8_i32_76 = arith.constant 8 : i32
    %151 = arith.muli %148, %c8_i32_76 : i32
    %152 = tpu.assume_multiple %151, 8 : i32
    %c0_77 = arith.constant 0 : index
    %c0_78 = arith.constant 0 : index
    %c0_79 = arith.constant 0 : index
    %153 = vector.load %arg13[%c0_77, %c0_78, %c0_79] : memref<2x8x32xf32, #tpu.memory_space<vmem>>, vector<1x8x32xf32>
    %154 = vector.shape_cast %153 : vector<1x8x32xf32> to vector<8x32xf32>
    %c0_80 = arith.constant 0 : index
    %c0_81 = arith.constant 0 : index
    %c0_82 = arith.constant 0 : index
    %155 = vector.load %arg14[%c0_80, %c0_81, %c0_82] : memref<2x8x32xf32, #tpu.memory_space<vmem>>, vector<1x8x32xf32>
    %156 = vector.shape_cast %155 : vector<1x8x32xf32> to vector<8x32xf32>
    %c1_83 = arith.constant 1 : index
    %c0_84 = arith.constant 0 : index
    %c0_85 = arith.constant 0 : index
    %157 = vector.load %arg13[%c1_83, %c0_84, %c0_85] : memref<2x8x32xf32, #tpu.memory_space<vmem>>, vector<1x8x32xf32>
    %158 = vector.shape_cast %157 : vector<1x8x32xf32> to vector<8x32xf32>
    %c1_86 = arith.constant 1 : index
    %c0_87 = arith.constant 0 : index
    %c0_88 = arith.constant 0 : index
    %159 = vector.load %arg14[%c1_86, %c0_87, %c0_88] : memref<2x8x32xf32, #tpu.memory_space<vmem>>, vector<1x8x32xf32>
    %160 = vector.shape_cast %159 : vector<1x8x32xf32> to vector<8x32xf32>
    %161 = arith.index_cast %150 : i32 to index
    %c0_89 = arith.constant 0 : index
    %162 = vector.load %arg11[%161, %c0_89] : memref<32x128xf32, #tpu.memory_space<vmem>>, vector<8x128xf32>
    %c0_90 = arith.constant 0 : index
    %c0_91 = arith.constant 0 : index
    %c0_92 = arith.constant 0 : index
    %163 = vector.load %arg5[%c0_90, %c0_91, %c0_92] : memref<2x32x128xf32, #tpu.memory_space<vmem>>, vector<1x32x128xf32>
    %164 = vector.shape_cast %163 : vector<1x32x128xf32> to vector<32x128xf32>
    %cst_93 = arith.constant dense<0.000000e+00> : vector<8x128xf32>
    %165 = tpu.matmul %154, %164, %cst_93 {dimension_numbers = #tpu.dot_dimension_numbers<[1], [0], [0], [1], [0, 0, 1, 1], [], []>} : vector<8x32xf32>, vector<32x128xf32>, vector<8x128xf32> -> vector<8x128xf32>
    %166 = arith.addf %162, %165 : vector<8x128xf32>
    %167 = arith.index_cast %152 : i32 to index
    %c0_94 = arith.constant 0 : index
    %168 = vector.load %arg12[%167, %c0_94] : memref<32x128xf32, #tpu.memory_space<vmem>>, vector<8x128xf32>
    %c1_95 = arith.constant 1 : index
    %c0_96 = arith.constant 0 : index
    %c0_97 = arith.constant 0 : index
    %169 = vector.load %arg5[%c1_95, %c0_96, %c0_97] : memref<2x32x128xf32, #tpu.memory_space<vmem>>, vector<1x32x128xf32>
    %170 = vector.shape_cast %169 : vector<1x32x128xf32> to vector<32x128xf32>
    %cst_98 = arith.constant dense<0.000000e+00> : vector<8x128xf32>
    %171 = tpu.matmul %158, %170, %cst_98 {dimension_numbers = #tpu.dot_dimension_numbers<[1], [0], [0], [1], [0, 0, 1, 1], [], []>} : vector<8x32xf32>, vector<32x128xf32>, vector<8x128xf32> -> vector<8x128xf32>
    %172 = arith.addf %168, %171 : vector<8x128xf32>
    %173 = vector.extract_strided_slice %166 {offsets = [0, 0], sizes = [8, 32], strides = [1, 1]} : vector<8x128xf32> to vector<8x32xf32>
    %174 = arith.negf %173 : vector<8x32xf32>
    %175 = math.exp %174 : vector<8x32xf32>
    %cst_99 = arith.constant 1.000000e+00 : f32
    %176 = vector.broadcast %cst_99 : f32 to vector<8x32xf32>
    %177 = arith.addf %176, %175 : vector<8x32xf32>
    %178 = arith.divf %176, %177 : vector<8x32xf32>
    %179 = vector.extract_strided_slice %166 {offsets = [0, 32], sizes = [8, 32], strides = [1, 1]} : vector<8x128xf32> to vector<8x32xf32>
    %180 = arith.negf %179 : vector<8x32xf32>
    %181 = math.exp %180 : vector<8x32xf32>
    %cst_100 = arith.constant 1.000000e+00 : f32
    %182 = vector.broadcast %cst_100 : f32 to vector<8x32xf32>
    %183 = arith.addf %182, %181 : vector<8x32xf32>
    %184 = arith.divf %182, %183 : vector<8x32xf32>
    %185 = vector.extract_strided_slice %166 {offsets = [0, 64], sizes = [8, 32], strides = [1, 1]} : vector<8x128xf32> to vector<8x32xf32>
    %186 = math.tanh %185 : vector<8x32xf32>
    %187 = vector.extract_strided_slice %166 {offsets = [0, 96], sizes = [8, 32], strides = [1, 1]} : vector<8x128xf32> to vector<8x32xf32>
    %188 = arith.negf %187 : vector<8x32xf32>
    %189 = math.exp %188 : vector<8x32xf32>
    %cst_101 = arith.constant 1.000000e+00 : f32
    %190 = vector.broadcast %cst_101 : f32 to vector<8x32xf32>
    %191 = arith.addf %190, %189 : vector<8x32xf32>
    %192 = arith.divf %190, %191 : vector<8x32xf32>
    %193 = arith.mulf %184, %156 : vector<8x32xf32>
    %194 = arith.mulf %178, %186 : vector<8x32xf32>
    %195 = arith.addf %193, %194 : vector<8x32xf32>
    %196 = math.tanh %195 : vector<8x32xf32>
    %197 = arith.mulf %192, %196 : vector<8x32xf32>
    %198 = vector.extract_strided_slice %172 {offsets = [0, 0], sizes = [8, 32], strides = [1, 1]} : vector<8x128xf32> to vector<8x32xf32>
    %199 = arith.negf %198 : vector<8x32xf32>
    %200 = math.exp %199 : vector<8x32xf32>
    %cst_102 = arith.constant 1.000000e+00 : f32
    %201 = vector.broadcast %cst_102 : f32 to vector<8x32xf32>
    %202 = arith.addf %201, %200 : vector<8x32xf32>
    %203 = arith.divf %201, %202 : vector<8x32xf32>
    %204 = vector.extract_strided_slice %172 {offsets = [0, 32], sizes = [8, 32], strides = [1, 1]} : vector<8x128xf32> to vector<8x32xf32>
    %205 = arith.negf %204 : vector<8x32xf32>
    %206 = math.exp %205 : vector<8x32xf32>
    %cst_103 = arith.constant 1.000000e+00 : f32
    %207 = vector.broadcast %cst_103 : f32 to vector<8x32xf32>
    %208 = arith.addf %207, %206 : vector<8x32xf32>
    %209 = arith.divf %207, %208 : vector<8x32xf32>
    %210 = vector.extract_strided_slice %172 {offsets = [0, 64], sizes = [8, 32], strides = [1, 1]} : vector<8x128xf32> to vector<8x32xf32>
    %211 = math.tanh %210 : vector<8x32xf32>
    %212 = vector.extract_strided_slice %172 {offsets = [0, 96], sizes = [8, 32], strides = [1, 1]} : vector<8x128xf32> to vector<8x32xf32>
    %213 = arith.negf %212 : vector<8x32xf32>
    %214 = math.exp %213 : vector<8x32xf32>
    %cst_104 = arith.constant 1.000000e+00 : f32
    %215 = vector.broadcast %cst_104 : f32 to vector<8x32xf32>
    %216 = arith.addf %215, %214 : vector<8x32xf32>
    %217 = arith.divf %215, %216 : vector<8x32xf32>
    %218 = arith.mulf %209, %160 : vector<8x32xf32>
    %219 = arith.mulf %203, %211 : vector<8x32xf32>
    %220 = arith.addf %218, %219 : vector<8x32xf32>
    %221 = math.tanh %220 : vector<8x32xf32>
    %222 = arith.mulf %217, %221 : vector<8x32xf32>
    %223 = arith.addi %24, %c1_i32_73 : i32
    %224 = vector.broadcast %223 : i32 to vector<8x1xi32>
    %225 = arith.cmpi slt, %224, %23 : vector<8x1xi32>
    %226 = arith.addi %26, %148 : i32
    %227 = vector.broadcast %226 : i32 to vector<8x1xi32>
    %228 = arith.cmpi slt, %227, %23 : vector<8x1xi32>
    %229 = vector.shape_cast %225 : vector<8x1xi1> to vector<8x1xi1>
    %230 = vector.broadcast %229 : vector<8x1xi1> to vector<8x32xi1>
    %231 = arith.select %230, %197, %154 : vector<8x32xi1>, vector<8x32xf32>
    %c0_105 = arith.constant 0 : index
    %c0_106 = arith.constant 0 : index
    %c0_107 = arith.constant 0 : index
    %232 = vector.load %arg13[%c0_105, %c0_106, %c0_107] : memref<2x8x32xf32, #tpu.memory_space<vmem>>, vector<1x8x32xf32>
    %233 = vector.shape_cast %232 : vector<1x8x32xf32> to vector<8x32xf32>
    %234 = vector.shape_cast %231 : vector<8x32xf32> to vector<1x8x32xf32>
    tpu.vector_store %arg13[%c0_105, %c0_106, %c0_107], %234 {strides = array<i32>} : memref<2x8x32xf32, #tpu.memory_space<vmem>>, vector<1x8x32xf32>,
    %235 = vector.shape_cast %225 : vector<8x1xi1> to vector<8x1xi1>
    %236 = vector.broadcast %235 : vector<8x1xi1> to vector<8x32xi1>
    %237 = arith.select %236, %195, %156 : vector<8x32xi1>, vector<8x32xf32>
    %c0_108 = arith.constant 0 : index
    %c0_109 = arith.constant 0 : index
    %c0_110 = arith.constant 0 : index
    %238 = vector.load %arg14[%c0_108, %c0_109, %c0_110] : memref<2x8x32xf32, #tpu.memory_space<vmem>>, vector<1x8x32xf32>
    %239 = vector.shape_cast %238 : vector<1x8x32xf32> to vector<8x32xf32>
    %240 = vector.shape_cast %237 : vector<8x32xf32> to vector<1x8x32xf32>
    tpu.vector_store %arg14[%c0_108, %c0_109, %c0_110], %240 {strides = array<i32>} : memref<2x8x32xf32, #tpu.memory_space<vmem>>, vector<1x8x32xf32>,
    %241 = vector.shape_cast %228 : vector<8x1xi1> to vector<8x1xi1>
    %242 = vector.broadcast %241 : vector<8x1xi1> to vector<8x32xi1>
    %243 = arith.select %242, %222, %158 : vector<8x32xi1>, vector<8x32xf32>
    %c1_111 = arith.constant 1 : index
    %c0_112 = arith.constant 0 : index
    %c0_113 = arith.constant 0 : index
    %244 = vector.load %arg13[%c1_111, %c0_112, %c0_113] : memref<2x8x32xf32, #tpu.memory_space<vmem>>, vector<1x8x32xf32>
    %245 = vector.shape_cast %244 : vector<1x8x32xf32> to vector<8x32xf32>
    %246 = vector.shape_cast %243 : vector<8x32xf32> to vector<1x8x32xf32>
    tpu.vector_store %arg13[%c1_111, %c0_112, %c0_113], %246 {strides = array<i32>} : memref<2x8x32xf32, #tpu.memory_space<vmem>>, vector<1x8x32xf32>,
    %247 = vector.shape_cast %228 : vector<8x1xi1> to vector<8x1xi1>
    %248 = vector.broadcast %247 : vector<8x1xi1> to vector<8x32xi1>
    %249 = arith.select %248, %220, %160 : vector<8x32xi1>, vector<8x32xf32>
    %c1_114 = arith.constant 1 : index
    %c0_115 = arith.constant 0 : index
    %c0_116 = arith.constant 0 : index
    %250 = vector.load %arg14[%c1_114, %c0_115, %c0_116] : memref<2x8x32xf32, #tpu.memory_space<vmem>>, vector<1x8x32xf32>
    %251 = vector.shape_cast %250 : vector<1x8x32xf32> to vector<8x32xf32>
    %252 = vector.shape_cast %249 : vector<8x32xf32> to vector<1x8x32xf32>
    tpu.vector_store %arg14[%c1_114, %c0_115, %c0_116], %252 {strides = array<i32>} : memref<2x8x32xf32, #tpu.memory_space<vmem>>, vector<1x8x32xf32>,
    %cst_117 = arith.constant 0.000000e+00 : f32
    %253 = vector.shape_cast %225 : vector<8x1xi1> to vector<8x1xi1>
    %254 = vector.broadcast %253 : vector<8x1xi1> to vector<8x32xi1>
    %255 = vector.broadcast %cst_117 : f32 to vector<8x32xf32>
    %256 = arith.select %254, %197, %255 : vector<8x32xi1>, vector<8x32xf32>
    %257 = arith.index_cast %c1_i32_73 : i32 to index
    %c0_118 = arith.constant 0 : index
    %c0_119 = arith.constant 0 : index
    %258 = vector.load %arg7[%257, %c0_118, %c0_119] : memref<4x8x32xf32, #tpu.memory_space<vmem>>, vector<1x8x32xf32>
    %259 = vector.shape_cast %258 : vector<1x8x32xf32> to vector<8x32xf32>
    %260 = vector.shape_cast %256 : vector<8x32xf32> to vector<1x8x32xf32>
    tpu.vector_store %arg7[%257, %c0_118, %c0_119], %260 {strides = array<i32>} : memref<4x8x32xf32, #tpu.memory_space<vmem>>, vector<1x8x32xf32>,
    %cst_120 = arith.constant 0.000000e+00 : f32
    %261 = vector.shape_cast %228 : vector<8x1xi1> to vector<8x1xi1>
    %262 = vector.broadcast %261 : vector<8x1xi1> to vector<8x32xi1>
    %263 = vector.broadcast %cst_120 : f32 to vector<8x32xf32>
    %264 = arith.select %262, %222, %263 : vector<8x32xi1>, vector<8x32xf32>
    %265 = arith.index_cast %148 : i32 to index
    %c0_121 = arith.constant 0 : index
    %c0_122 = arith.constant 0 : index
    %266 = vector.load %arg8[%265, %c0_121, %c0_122] : memref<4x8x32xf32, #tpu.memory_space<vmem>>, vector<1x8x32xf32>
    %267 = vector.shape_cast %266 : vector<1x8x32xf32> to vector<8x32xf32>
    %268 = vector.shape_cast %264 : vector<8x32xf32> to vector<1x8x32xf32>
    tpu.vector_store %arg8[%265, %c0_121, %c0_122], %268 {strides = array<i32>} : memref<4x8x32xf32, #tpu.memory_space<vmem>>, vector<1x8x32xf32>,
    %c2_i32 = arith.constant 2 : i32
    %c3_i32_123 = arith.constant 3 : i32
    %269 = arith.subi %c3_i32_123, %c2_i32 : i32
    %c8_i32_124 = arith.constant 8 : i32
    %270 = arith.muli %c2_i32, %c8_i32_124 : i32
    %271 = tpu.assume_multiple %270, 8 : i32
    %c8_i32_125 = arith.constant 8 : i32
    %272 = arith.muli %269, %c8_i32_125 : i32
    %273 = tpu.assume_multiple %272, 8 : i32
    %c0_126 = arith.constant 0 : index
    %c0_127 = arith.constant 0 : index
    %c0_128 = arith.constant 0 : index
    %274 = vector.load %arg13[%c0_126, %c0_127, %c0_128] : memref<2x8x32xf32, #tpu.memory_space<vmem>>, vector<1x8x32xf32>
    %275 = vector.shape_cast %274 : vector<1x8x32xf32> to vector<8x32xf32>
    %c0_129 = arith.constant 0 : index
    %c0_130 = arith.constant 0 : index
    %c0_131 = arith.constant 0 : index
    %276 = vector.load %arg14[%c0_129, %c0_130, %c0_131] : memref<2x8x32xf32, #tpu.memory_space<vmem>>, vector<1x8x32xf32>
    %277 = vector.shape_cast %276 : vector<1x8x32xf32> to vector<8x32xf32>
    %c1_132 = arith.constant 1 : index
    %c0_133 = arith.constant 0 : index
    %c0_134 = arith.constant 0 : index
    %278 = vector.load %arg13[%c1_132, %c0_133, %c0_134] : memref<2x8x32xf32, #tpu.memory_space<vmem>>, vector<1x8x32xf32>
    %279 = vector.shape_cast %278 : vector<1x8x32xf32> to vector<8x32xf32>
    %c1_135 = arith.constant 1 : index
    %c0_136 = arith.constant 0 : index
    %c0_137 = arith.constant 0 : index
    %280 = vector.load %arg14[%c1_135, %c0_136, %c0_137] : memref<2x8x32xf32, #tpu.memory_space<vmem>>, vector<1x8x32xf32>
    %281 = vector.shape_cast %280 : vector<1x8x32xf32> to vector<8x32xf32>
    %282 = arith.index_cast %271 : i32 to index
    %c0_138 = arith.constant 0 : index
    %283 = vector.load %arg11[%282, %c0_138] : memref<32x128xf32, #tpu.memory_space<vmem>>, vector<8x128xf32>
    %c0_139 = arith.constant 0 : index
    %c0_140 = arith.constant 0 : index
    %c0_141 = arith.constant 0 : index
    %284 = vector.load %arg5[%c0_139, %c0_140, %c0_141] : memref<2x32x128xf32, #tpu.memory_space<vmem>>, vector<1x32x128xf32>
    %285 = vector.shape_cast %284 : vector<1x32x128xf32> to vector<32x128xf32>
    %cst_142 = arith.constant dense<0.000000e+00> : vector<8x128xf32>
    %286 = tpu.matmul %275, %285, %cst_142 {dimension_numbers = #tpu.dot_dimension_numbers<[1], [0], [0], [1], [0, 0, 1, 1], [], []>} : vector<8x32xf32>, vector<32x128xf32>, vector<8x128xf32> -> vector<8x128xf32>
    %287 = arith.addf %283, %286 : vector<8x128xf32>
    %288 = arith.index_cast %273 : i32 to index
    %c0_143 = arith.constant 0 : index
    %289 = vector.load %arg12[%288, %c0_143] : memref<32x128xf32, #tpu.memory_space<vmem>>, vector<8x128xf32>
    %c1_144 = arith.constant 1 : index
    %c0_145 = arith.constant 0 : index
    %c0_146 = arith.constant 0 : index
    %290 = vector.load %arg5[%c1_144, %c0_145, %c0_146] : memref<2x32x128xf32, #tpu.memory_space<vmem>>, vector<1x32x128xf32>
    %291 = vector.shape_cast %290 : vector<1x32x128xf32> to vector<32x128xf32>
    %cst_147 = arith.constant dense<0.000000e+00> : vector<8x128xf32>
    %292 = tpu.matmul %279, %291, %cst_147 {dimension_numbers = #tpu.dot_dimension_numbers<[1], [0], [0], [1], [0, 0, 1, 1], [], []>} : vector<8x32xf32>, vector<32x128xf32>, vector<8x128xf32> -> vector<8x128xf32>
    %293 = arith.addf %289, %292 : vector<8x128xf32>
    %294 = vector.extract_strided_slice %287 {offsets = [0, 0], sizes = [8, 32], strides = [1, 1]} : vector<8x128xf32> to vector<8x32xf32>
    %295 = arith.negf %294 : vector<8x32xf32>
    %296 = math.exp %295 : vector<8x32xf32>
    %cst_148 = arith.constant 1.000000e+00 : f32
    %297 = vector.broadcast %cst_148 : f32 to vector<8x32xf32>
    %298 = arith.addf %297, %296 : vector<8x32xf32>
    %299 = arith.divf %297, %298 : vector<8x32xf32>
    %300 = vector.extract_strided_slice %287 {offsets = [0, 32], sizes = [8, 32], strides = [1, 1]} : vector<8x128xf32> to vector<8x32xf32>
    %301 = arith.negf %300 : vector<8x32xf32>
    %302 = math.exp %301 : vector<8x32xf32>
    %cst_149 = arith.constant 1.000000e+00 : f32
    %303 = vector.broadcast %cst_149 : f32 to vector<8x32xf32>
    %304 = arith.addf %303, %302 : vector<8x32xf32>
    %305 = arith.divf %303, %304 : vector<8x32xf32>
    %306 = vector.extract_strided_slice %287 {offsets = [0, 64], sizes = [8, 32], strides = [1, 1]} : vector<8x128xf32> to vector<8x32xf32>
    %307 = math.tanh %306 : vector<8x32xf32>
    %308 = vector.extract_strided_slice %287 {offsets = [0, 96], sizes = [8, 32], strides = [1, 1]} : vector<8x128xf32> to vector<8x32xf32>
    %309 = arith.negf %308 : vector<8x32xf32>
    %310 = math.exp %309 : vector<8x32xf32>
    %cst_150 = arith.constant 1.000000e+00 : f32
    %311 = vector.broadcast %cst_150 : f32 to vector<8x32xf32>
    %312 = arith.addf %311, %310 : vector<8x32xf32>
    %313 = arith.divf %311, %312 : vector<8x32xf32>
    %314 = arith.mulf %305, %277 : vector<8x32xf32>
    %315 = arith.mulf %299, %307 : vector<8x32xf32>
    %316 = arith.addf %314, %315 : vector<8x32xf32>
    %317 = math.tanh %316 : vector<8x32xf32>
    %318 = arith.mulf %313, %317 : vector<8x32xf32>
    %319 = vector.extract_strided_slice %293 {offsets = [0, 0], sizes = [8, 32], strides = [1, 1]} : vector<8x128xf32> to vector<8x32xf32>
    %320 = arith.negf %319 : vector<8x32xf32>
    %321 = math.exp %320 : vector<8x32xf32>
    %cst_151 = arith.constant 1.000000e+00 : f32
    %322 = vector.broadcast %cst_151 : f32 to vector<8x32xf32>
    %323 = arith.addf %322, %321 : vector<8x32xf32>
    %324 = arith.divf %322, %323 : vector<8x32xf32>
    %325 = vector.extract_strided_slice %293 {offsets = [0, 32], sizes = [8, 32], strides = [1, 1]} : vector<8x128xf32> to vector<8x32xf32>
    %326 = arith.negf %325 : vector<8x32xf32>
    %327 = math.exp %326 : vector<8x32xf32>
    %cst_152 = arith.constant 1.000000e+00 : f32
    %328 = vector.broadcast %cst_152 : f32 to vector<8x32xf32>
    %329 = arith.addf %328, %327 : vector<8x32xf32>
    %330 = arith.divf %328, %329 : vector<8x32xf32>
    %331 = vector.extract_strided_slice %293 {offsets = [0, 64], sizes = [8, 32], strides = [1, 1]} : vector<8x128xf32> to vector<8x32xf32>
    %332 = math.tanh %331 : vector<8x32xf32>
    %333 = vector.extract_strided_slice %293 {offsets = [0, 96], sizes = [8, 32], strides = [1, 1]} : vector<8x128xf32> to vector<8x32xf32>
    %334 = arith.negf %333 : vector<8x32xf32>
    %335 = math.exp %334 : vector<8x32xf32>
    %cst_153 = arith.constant 1.000000e+00 : f32
    %336 = vector.broadcast %cst_153 : f32 to vector<8x32xf32>
    %337 = arith.addf %336, %335 : vector<8x32xf32>
    %338 = arith.divf %336, %337 : vector<8x32xf32>
    %339 = arith.mulf %330, %281 : vector<8x32xf32>
    %340 = arith.mulf %324, %332 : vector<8x32xf32>
    %341 = arith.addf %339, %340 : vector<8x32xf32>
    %342 = math.tanh %341 : vector<8x32xf32>
    %343 = arith.mulf %338, %342 : vector<8x32xf32>
    %344 = arith.addi %24, %c2_i32 : i32
    %345 = vector.broadcast %344 : i32 to vector<8x1xi32>
    %346 = arith.cmpi slt, %345, %23 : vector<8x1xi32>
    %347 = arith.addi %26, %269 : i32
    %348 = vector.broadcast %347 : i32 to vector<8x1xi32>
    %349 = arith.cmpi slt, %348, %23 : vector<8x1xi32>
    %350 = vector.shape_cast %346 : vector<8x1xi1> to vector<8x1xi1>
    %351 = vector.broadcast %350 : vector<8x1xi1> to vector<8x32xi1>
    %352 = arith.select %351, %318, %275 : vector<8x32xi1>, vector<8x32xf32>
    %c0_154 = arith.constant 0 : index
    %c0_155 = arith.constant 0 : index
    %c0_156 = arith.constant 0 : index
    %353 = vector.load %arg13[%c0_154, %c0_155, %c0_156] : memref<2x8x32xf32, #tpu.memory_space<vmem>>, vector<1x8x32xf32>
    %354 = vector.shape_cast %353 : vector<1x8x32xf32> to vector<8x32xf32>
    %355 = vector.shape_cast %352 : vector<8x32xf32> to vector<1x8x32xf32>
    tpu.vector_store %arg13[%c0_154, %c0_155, %c0_156], %355 {strides = array<i32>} : memref<2x8x32xf32, #tpu.memory_space<vmem>>, vector<1x8x32xf32>,
    %356 = vector.shape_cast %346 : vector<8x1xi1> to vector<8x1xi1>
    %357 = vector.broadcast %356 : vector<8x1xi1> to vector<8x32xi1>
    %358 = arith.select %357, %316, %277 : vector<8x32xi1>, vector<8x32xf32>
    %c0_157 = arith.constant 0 : index
    %c0_158 = arith.constant 0 : index
    %c0_159 = arith.constant 0 : index
    %359 = vector.load %arg14[%c0_157, %c0_158, %c0_159] : memref<2x8x32xf32, #tpu.memory_space<vmem>>, vector<1x8x32xf32>
    %360 = vector.shape_cast %359 : vector<1x8x32xf32> to vector<8x32xf32>
    %361 = vector.shape_cast %358 : vector<8x32xf32> to vector<1x8x32xf32>
    tpu.vector_store %arg14[%c0_157, %c0_158, %c0_159], %361 {strides = array<i32>} : memref<2x8x32xf32, #tpu.memory_space<vmem>>, vector<1x8x32xf32>,
    %362 = vector.shape_cast %349 : vector<8x1xi1> to vector<8x1xi1>
    %363 = vector.broadcast %362 : vector<8x1xi1> to vector<8x32xi1>
    %364 = arith.select %363, %343, %279 : vector<8x32xi1>, vector<8x32xf32>
    %c1_160 = arith.constant 1 : index
    %c0_161 = arith.constant 0 : index
    %c0_162 = arith.constant 0 : index
    %365 = vector.load %arg13[%c1_160, %c0_161, %c0_162] : memref<2x8x32xf32, #tpu.memory_space<vmem>>, vector<1x8x32xf32>
    %366 = vector.shape_cast %365 : vector<1x8x32xf32> to vector<8x32xf32>
    %367 = vector.shape_cast %364 : vector<8x32xf32> to vector<1x8x32xf32>
    tpu.vector_store %arg13[%c1_160, %c0_161, %c0_162], %367 {strides = array<i32>} : memref<2x8x32xf32, #tpu.memory_space<vmem>>, vector<1x8x32xf32>,
    %368 = vector.shape_cast %349 : vector<8x1xi1> to vector<8x1xi1>
    %369 = vector.broadcast %368 : vector<8x1xi1> to vector<8x32xi1>
    %370 = arith.select %369, %341, %281 : vector<8x32xi1>, vector<8x32xf32>
    %c1_163 = arith.constant 1 : index
    %c0_164 = arith.constant 0 : index
    %c0_165 = arith.constant 0 : index
    %371 = vector.load %arg14[%c1_163, %c0_164, %c0_165] : memref<2x8x32xf32, #tpu.memory_space<vmem>>, vector<1x8x32xf32>
    %372 = vector.shape_cast %371 : vector<1x8x32xf32> to vector<8x32xf32>
    %373 = vector.shape_cast %370 : vector<8x32xf32> to vector<1x8x32xf32>
    tpu.vector_store %arg14[%c1_163, %c0_164, %c0_165], %373 {strides = array<i32>} : memref<2x8x32xf32, #tpu.memory_space<vmem>>, vector<1x8x32xf32>,
    %cst_166 = arith.constant 0.000000e+00 : f32
    %374 = vector.shape_cast %346 : vector<8x1xi1> to vector<8x1xi1>
    %375 = vector.broadcast %374 : vector<8x1xi1> to vector<8x32xi1>
    %376 = vector.broadcast %cst_166 : f32 to vector<8x32xf32>
    %377 = arith.select %375, %318, %376 : vector<8x32xi1>, vector<8x32xf32>
    %378 = arith.index_cast %c2_i32 : i32 to index
    %c0_167 = arith.constant 0 : index
    %c0_168 = arith.constant 0 : index
    %379 = vector.load %arg7[%378, %c0_167, %c0_168] : memref<4x8x32xf32, #tpu.memory_space<vmem>>, vector<1x8x32xf32>
    %380 = vector.shape_cast %379 : vector<1x8x32xf32> to vector<8x32xf32>
    %381 = vector.shape_cast %377 : vector<8x32xf32> to vector<1x8x32xf32>
    tpu.vector_store %arg7[%378, %c0_167, %c0_168], %381 {strides = array<i32>} : memref<4x8x32xf32, #tpu.memory_space<vmem>>, vector<1x8x32xf32>,
    %cst_169 = arith.constant 0.000000e+00 : f32
    %382 = vector.shape_cast %349 : vector<8x1xi1> to vector<8x1xi1>
    %383 = vector.broadcast %382 : vector<8x1xi1> to vector<8x32xi1>
    %384 = vector.broadcast %cst_169 : f32 to vector<8x32xf32>
    %385 = arith.select %383, %343, %384 : vector<8x32xi1>, vector<8x32xf32>
    %386 = arith.index_cast %269 : i32 to index
    %c0_170 = arith.constant 0 : index
    %c0_171 = arith.constant 0 : index
    %387 = vector.load %arg8[%386, %c0_170, %c0_171] : memref<4x8x32xf32, #tpu.memory_space<vmem>>, vector<1x8x32xf32>
    %388 = vector.shape_cast %387 : vector<1x8x32xf32> to vector<8x32xf32>
    %389 = vector.shape_cast %385 : vector<8x32xf32> to vector<1x8x32xf32>
    tpu.vector_store %arg8[%386, %c0_170, %c0_171], %389 {strides = array<i32>} : memref<4x8x32xf32, #tpu.memory_space<vmem>>, vector<1x8x32xf32>,
    %c3_i32_172 = arith.constant 3 : i32
    %c3_i32_173 = arith.constant 3 : i32
    %390 = arith.subi %c3_i32_173, %c3_i32_172 : i32
    %c8_i32_174 = arith.constant 8 : i32
    %391 = arith.muli %c3_i32_172, %c8_i32_174 : i32
    %392 = tpu.assume_multiple %391, 8 : i32
    %c8_i32_175 = arith.constant 8 : i32
    %393 = arith.muli %390, %c8_i32_175 : i32
    %394 = tpu.assume_multiple %393, 8 : i32
    %c0_176 = arith.constant 0 : index
    %c0_177 = arith.constant 0 : index
    %c0_178 = arith.constant 0 : index
    %395 = vector.load %arg13[%c0_176, %c0_177, %c0_178] : memref<2x8x32xf32, #tpu.memory_space<vmem>>, vector<1x8x32xf32>
    %396 = vector.shape_cast %395 : vector<1x8x32xf32> to vector<8x32xf32>
    %c0_179 = arith.constant 0 : index
    %c0_180 = arith.constant 0 : index
    %c0_181 = arith.constant 0 : index
    %397 = vector.load %arg14[%c0_179, %c0_180, %c0_181] : memref<2x8x32xf32, #tpu.memory_space<vmem>>, vector<1x8x32xf32>
    %398 = vector.shape_cast %397 : vector<1x8x32xf32> to vector<8x32xf32>
    %c1_182 = arith.constant 1 : index
    %c0_183 = arith.constant 0 : index
    %c0_184 = arith.constant 0 : index
    %399 = vector.load %arg13[%c1_182, %c0_183, %c0_184] : memref<2x8x32xf32, #tpu.memory_space<vmem>>, vector<1x8x32xf32>
    %400 = vector.shape_cast %399 : vector<1x8x32xf32> to vector<8x32xf32>
    %c1_185 = arith.constant 1 : index
    %c0_186 = arith.constant 0 : index
    %c0_187 = arith.constant 0 : index
    %401 = vector.load %arg14[%c1_185, %c0_186, %c0_187] : memref<2x8x32xf32, #tpu.memory_space<vmem>>, vector<1x8x32xf32>
    %402 = vector.shape_cast %401 : vector<1x8x32xf32> to vector<8x32xf32>
    %403 = arith.index_cast %392 : i32 to index
    %c0_188 = arith.constant 0 : index
    %404 = vector.load %arg11[%403, %c0_188] : memref<32x128xf32, #tpu.memory_space<vmem>>, vector<8x128xf32>
    %c0_189 = arith.constant 0 : index
    %c0_190 = arith.constant 0 : index
    %c0_191 = arith.constant 0 : index
    %405 = vector.load %arg5[%c0_189, %c0_190, %c0_191] : memref<2x32x128xf32, #tpu.memory_space<vmem>>, vector<1x32x128xf32>
    %406 = vector.shape_cast %405 : vector<1x32x128xf32> to vector<32x128xf32>
    %cst_192 = arith.constant dense<0.000000e+00> : vector<8x128xf32>
    %407 = tpu.matmul %396, %406, %cst_192 {dimension_numbers = #tpu.dot_dimension_numbers<[1], [0], [0], [1], [0, 0, 1, 1], [], []>} : vector<8x32xf32>, vector<32x128xf32>, vector<8x128xf32> -> vector<8x128xf32>
    %408 = arith.addf %404, %407 : vector<8x128xf32>
    %409 = arith.index_cast %394 : i32 to index
    %c0_193 = arith.constant 0 : index
    %410 = vector.load %arg12[%409, %c0_193] : memref<32x128xf32, #tpu.memory_space<vmem>>, vector<8x128xf32>
    %c1_194 = arith.constant 1 : index
    %c0_195 = arith.constant 0 : index
    %c0_196 = arith.constant 0 : index
    %411 = vector.load %arg5[%c1_194, %c0_195, %c0_196] : memref<2x32x128xf32, #tpu.memory_space<vmem>>, vector<1x32x128xf32>
    %412 = vector.shape_cast %411 : vector<1x32x128xf32> to vector<32x128xf32>
    %cst_197 = arith.constant dense<0.000000e+00> : vector<8x128xf32>
    %413 = tpu.matmul %400, %412, %cst_197 {dimension_numbers = #tpu.dot_dimension_numbers<[1], [0], [0], [1], [0, 0, 1, 1], [], []>} : vector<8x32xf32>, vector<32x128xf32>, vector<8x128xf32> -> vector<8x128xf32>
    %414 = arith.addf %410, %413 : vector<8x128xf32>
    %415 = vector.extract_strided_slice %408 {offsets = [0, 0], sizes = [8, 32], strides = [1, 1]} : vector<8x128xf32> to vector<8x32xf32>
    %416 = arith.negf %415 : vector<8x32xf32>
    %417 = math.exp %416 : vector<8x32xf32>
    %cst_198 = arith.constant 1.000000e+00 : f32
    %418 = vector.broadcast %cst_198 : f32 to vector<8x32xf32>
    %419 = arith.addf %418, %417 : vector<8x32xf32>
    %420 = arith.divf %418, %419 : vector<8x32xf32>
    %421 = vector.extract_strided_slice %408 {offsets = [0, 32], sizes = [8, 32], strides = [1, 1]} : vector<8x128xf32> to vector<8x32xf32>
    %422 = arith.negf %421 : vector<8x32xf32>
    %423 = math.exp %422 : vector<8x32xf32>
    %cst_199 = arith.constant 1.000000e+00 : f32
    %424 = vector.broadcast %cst_199 : f32 to vector<8x32xf32>
    %425 = arith.addf %424, %423 : vector<8x32xf32>
    %426 = arith.divf %424, %425 : vector<8x32xf32>
    %427 = vector.extract_strided_slice %408 {offsets = [0, 64], sizes = [8, 32], strides = [1, 1]} : vector<8x128xf32> to vector<8x32xf32>
    %428 = math.tanh %427 : vector<8x32xf32>
    %429 = vector.extract_strided_slice %408 {offsets = [0, 96], sizes = [8, 32], strides = [1, 1]} : vector<8x128xf32> to vector<8x32xf32>
    %430 = arith.negf %429 : vector<8x32xf32>
    %431 = math.exp %430 : vector<8x32xf32>
    %cst_200 = arith.constant 1.000000e+00 : f32
    %432 = vector.broadcast %cst_200 : f32 to vector<8x32xf32>
    %433 = arith.addf %432, %431 : vector<8x32xf32>
    %434 = arith.divf %432, %433 : vector<8x32xf32>
    %435 = arith.mulf %426, %398 : vector<8x32xf32>
    %436 = arith.mulf %420, %428 : vector<8x32xf32>
    %437 = arith.addf %435, %436 : vector<8x32xf32>
    %438 = math.tanh %437 : vector<8x32xf32>
    %439 = arith.mulf %434, %438 : vector<8x32xf32>
    %440 = vector.extract_strided_slice %414 {offsets = [0, 0], sizes = [8, 32], strides = [1, 1]} : vector<8x128xf32> to vector<8x32xf32>
    %441 = arith.negf %440 : vector<8x32xf32>
    %442 = math.exp %441 : vector<8x32xf32>
    %cst_201 = arith.constant 1.000000e+00 : f32
    %443 = vector.broadcast %cst_201 : f32 to vector<8x32xf32>
    %444 = arith.addf %443, %442 : vector<8x32xf32>
    %445 = arith.divf %443, %444 : vector<8x32xf32>
    %446 = vector.extract_strided_slice %414 {offsets = [0, 32], sizes = [8, 32], strides = [1, 1]} : vector<8x128xf32> to vector<8x32xf32>
    %447 = arith.negf %446 : vector<8x32xf32>
    %448 = math.exp %447 : vector<8x32xf32>
    %cst_202 = arith.constant 1.000000e+00 : f32
    %449 = vector.broadcast %cst_202 : f32 to vector<8x32xf32>
    %450 = arith.addf %449, %448 : vector<8x32xf32>
    %451 = arith.divf %449, %450 : vector<8x32xf32>
    %452 = vector.extract_strided_slice %414 {offsets = [0, 64], sizes = [8, 32], strides = [1, 1]} : vector<8x128xf32> to vector<8x32xf32>
    %453 = math.tanh %452 : vector<8x32xf32>
    %454 = vector.extract_strided_slice %414 {offsets = [0, 96], sizes = [8, 32], strides = [1, 1]} : vector<8x128xf32> to vector<8x32xf32>
    %455 = arith.negf %454 : vector<8x32xf32>
    %456 = math.exp %455 : vector<8x32xf32>
    %cst_203 = arith.constant 1.000000e+00 : f32
    %457 = vector.broadcast %cst_203 : f32 to vector<8x32xf32>
    %458 = arith.addf %457, %456 : vector<8x32xf32>
    %459 = arith.divf %457, %458 : vector<8x32xf32>
    %460 = arith.mulf %451, %402 : vector<8x32xf32>
    %461 = arith.mulf %445, %453 : vector<8x32xf32>
    %462 = arith.addf %460, %461 : vector<8x32xf32>
    %463 = math.tanh %462 : vector<8x32xf32>
    %464 = arith.mulf %459, %463 : vector<8x32xf32>
    %465 = arith.addi %24, %c3_i32_172 : i32
    %466 = vector.broadcast %465 : i32 to vector<8x1xi32>
    %467 = arith.cmpi slt, %466, %23 : vector<8x1xi32>
    %468 = arith.addi %26, %390 : i32
    %469 = vector.broadcast %468 : i32 to vector<8x1xi32>
    %470 = arith.cmpi slt, %469, %23 : vector<8x1xi32>
    %471 = vector.shape_cast %467 : vector<8x1xi1> to vector<8x1xi1>
    %472 = vector.broadcast %471 : vector<8x1xi1> to vector<8x32xi1>
    %473 = arith.select %472, %439, %396 : vector<8x32xi1>, vector<8x32xf32>
    %c0_204 = arith.constant 0 : index
    %c0_205 = arith.constant 0 : index
    %c0_206 = arith.constant 0 : index
    %474 = vector.load %arg13[%c0_204, %c0_205, %c0_206] : memref<2x8x32xf32, #tpu.memory_space<vmem>>, vector<1x8x32xf32>
    %475 = vector.shape_cast %474 : vector<1x8x32xf32> to vector<8x32xf32>
    %476 = vector.shape_cast %473 : vector<8x32xf32> to vector<1x8x32xf32>
    tpu.vector_store %arg13[%c0_204, %c0_205, %c0_206], %476 {strides = array<i32>} : memref<2x8x32xf32, #tpu.memory_space<vmem>>, vector<1x8x32xf32>,
    %477 = vector.shape_cast %467 : vector<8x1xi1> to vector<8x1xi1>
    %478 = vector.broadcast %477 : vector<8x1xi1> to vector<8x32xi1>
    %479 = arith.select %478, %437, %398 : vector<8x32xi1>, vector<8x32xf32>
    %c0_207 = arith.constant 0 : index
    %c0_208 = arith.constant 0 : index
    %c0_209 = arith.constant 0 : index
    %480 = vector.load %arg14[%c0_207, %c0_208, %c0_209] : memref<2x8x32xf32, #tpu.memory_space<vmem>>, vector<1x8x32xf32>
    %481 = vector.shape_cast %480 : vector<1x8x32xf32> to vector<8x32xf32>
    %482 = vector.shape_cast %479 : vector<8x32xf32> to vector<1x8x32xf32>
    tpu.vector_store %arg14[%c0_207, %c0_208, %c0_209], %482 {strides = array<i32>} : memref<2x8x32xf32, #tpu.memory_space<vmem>>, vector<1x8x32xf32>,
    %483 = vector.shape_cast %470 : vector<8x1xi1> to vector<8x1xi1>
    %484 = vector.broadcast %483 : vector<8x1xi1> to vector<8x32xi1>
    %485 = arith.select %484, %464, %400 : vector<8x32xi1>, vector<8x32xf32>
    %c1_210 = arith.constant 1 : index
    %c0_211 = arith.constant 0 : index
    %c0_212 = arith.constant 0 : index
    %486 = vector.load %arg13[%c1_210, %c0_211, %c0_212] : memref<2x8x32xf32, #tpu.memory_space<vmem>>, vector<1x8x32xf32>
    %487 = vector.shape_cast %486 : vector<1x8x32xf32> to vector<8x32xf32>
    %488 = vector.shape_cast %485 : vector<8x32xf32> to vector<1x8x32xf32>
    tpu.vector_store %arg13[%c1_210, %c0_211, %c0_212], %488 {strides = array<i32>} : memref<2x8x32xf32, #tpu.memory_space<vmem>>, vector<1x8x32xf32>,
    %489 = vector.shape_cast %470 : vector<8x1xi1> to vector<8x1xi1>
    %490 = vector.broadcast %489 : vector<8x1xi1> to vector<8x32xi1>
    %491 = arith.select %490, %462, %402 : vector<8x32xi1>, vector<8x32xf32>
    %c1_213 = arith.constant 1 : index
    %c0_214 = arith.constant 0 : index
    %c0_215 = arith.constant 0 : index
    %492 = vector.load %arg14[%c1_213, %c0_214, %c0_215] : memref<2x8x32xf32, #tpu.memory_space<vmem>>, vector<1x8x32xf32>
    %493 = vector.shape_cast %492 : vector<1x8x32xf32> to vector<8x32xf32>
    %494 = vector.shape_cast %491 : vector<8x32xf32> to vector<1x8x32xf32>
    tpu.vector_store %arg14[%c1_213, %c0_214, %c0_215], %494 {strides = array<i32>} : memref<2x8x32xf32, #tpu.memory_space<vmem>>, vector<1x8x32xf32>,
    %cst_216 = arith.constant 0.000000e+00 : f32
    %495 = vector.shape_cast %467 : vector<8x1xi1> to vector<8x1xi1>
    %496 = vector.broadcast %495 : vector<8x1xi1> to vector<8x32xi1>
    %497 = vector.broadcast %cst_216 : f32 to vector<8x32xf32>
    %498 = arith.select %496, %439, %497 : vector<8x32xi1>, vector<8x32xf32>
    %499 = arith.index_cast %c3_i32_172 : i32 to index
    %c0_217 = arith.constant 0 : index
    %c0_218 = arith.constant 0 : index
    %500 = vector.load %arg7[%499, %c0_217, %c0_218] : memref<4x8x32xf32, #tpu.memory_space<vmem>>, vector<1x8x32xf32>
    %501 = vector.shape_cast %500 : vector<1x8x32xf32> to vector<8x32xf32>
    %502 = vector.shape_cast %498 : vector<8x32xf32> to vector<1x8x32xf32>
    tpu.vector_store %arg7[%499, %c0_217, %c0_218], %502 {strides = array<i32>} : memref<4x8x32xf32, #tpu.memory_space<vmem>>, vector<1x8x32xf32>,
    %cst_219 = arith.constant 0.000000e+00 : f32
    %503 = vector.shape_cast %470 : vector<8x1xi1> to vector<8x1xi1>
    %504 = vector.broadcast %503 : vector<8x1xi1> to vector<8x32xi1>
    %505 = vector.broadcast %cst_219 : f32 to vector<8x32xf32>
    %506 = arith.select %504, %464, %505 : vector<8x32xi1>, vector<8x32xf32>
    %507 = arith.index_cast %390 : i32 to index
    %c0_220 = arith.constant 0 : index
    %c0_221 = arith.constant 0 : index
    %508 = vector.load %arg8[%507, %c0_220, %c0_221] : memref<4x8x32xf32, #tpu.memory_space<vmem>>, vector<1x8x32xf32>
    %509 = vector.shape_cast %508 : vector<1x8x32xf32> to vector<8x32xf32>
    %510 = vector.shape_cast %506 : vector<8x32xf32> to vector<1x8x32xf32>
    tpu.vector_store %arg8[%507, %c0_220, %c0_221], %510 {strides = array<i32>} : memref<4x8x32xf32, #tpu.memory_space<vmem>>, vector<1x8x32xf32>,
    %c4_i32_222 = arith.constant 4 : i32
    %c1_i32_223 = arith.constant 1 : i32
    %511 = arith.cmpi eq, %arg0, %c1_i32_223 : i32
    %512 = arith.extui %511 : i1 to i32
    %c0_i32_224 = arith.constant 0 : i32
    %513 = arith.cmpi ne, %512, %c0_i32_224 : i32
    scf.if %513 {
      %c0_225 = arith.constant 0 : index
      %c0_226 = arith.constant 0 : index
      %c0_227 = arith.constant 0 : index
      %514 = vector.load %arg13[%c0_225, %c0_226, %c0_227] : memref<2x8x32xf32, #tpu.memory_space<vmem>>, vector<2x8x32xf32>
      %c0_228 = arith.constant 0 : index
      %c0_229 = arith.constant 0 : index
      %c0_230 = arith.constant 0 : index
      %515 = vector.load %arg9[%c0_228, %c0_229, %c0_230] : memref<2x8x32xf32, #tpu.memory_space<vmem>>, vector<2x8x32xf32>
      tpu.vector_store %arg9[%c0_228, %c0_229, %c0_230], %514 {strides = array<i32>} : memref<2x8x32xf32, #tpu.memory_space<vmem>>, vector<2x8x32xf32>,
      %c0_231 = arith.constant 0 : index
      %c0_232 = arith.constant 0 : index
      %c0_233 = arith.constant 0 : index
      %516 = vector.load %arg14[%c0_231, %c0_232, %c0_233] : memref<2x8x32xf32, #tpu.memory_space<vmem>>, vector<2x8x32xf32>
      %c0_234 = arith.constant 0 : index
      %c0_235 = arith.constant 0 : index
      %c0_236 = arith.constant 0 : index
      %517 = vector.load %arg10[%c0_234, %c0_235, %c0_236] : memref<2x8x32xf32, #tpu.memory_space<vmem>>, vector<2x8x32xf32>
      tpu.vector_store %arg10[%c0_234, %c0_235, %c0_236], %516 {strides = array<i32>} : memref<2x8x32xf32, #tpu.memory_space<vmem>>, vector<2x8x32xf32>,
    } else {
    }
    return
  }
  func.func @transform_0(%arg0: i32) -> (i32, i32) {
    %c0_i32 = arith.constant 0 : i32
    %c0_i32_0 = arith.constant 0 : i32
    %c0_i32_1 = arith.constant 0 : i32
    return %c0_i32, %c0_i32_0 : i32, i32
  }
  func.func @transform_1(%arg0: i32) -> (i32, i32, i32) {
    %c0_i32 = arith.constant 0 : i32
    %c0_i32_0 = arith.constant 0 : i32
    %c0_i32_1 = arith.constant 0 : i32
    return %arg0, %c0_i32, %c0_i32_0 : i32, i32, i32
  }
  func.func @transform_2(%arg0: i32) -> (i32, i32, i32) {
    %c1_i32 = arith.constant 1 : i32
    %0 = arith.subi %c1_i32, %arg0 : i32
    %c0_i32 = arith.constant 0 : i32
    %c0_i32_0 = arith.constant 0 : i32
    %c0_i32_1 = arith.constant 0 : i32
    return %0, %c0_i32, %c0_i32_0 : i32, i32, i32
  }
  func.func @transform_3(%arg0: i32) -> (i32, i32, i32) {
    %c0_i32 = arith.constant 0 : i32
    %c0_i32_0 = arith.constant 0 : i32
    %c0_i32_1 = arith.constant 0 : i32
    %c0_i32_2 = arith.constant 0 : i32
    return %c0_i32, %c0_i32_0, %c0_i32_1 : i32, i32, i32
  }
  func.func @transform_4(%arg0: i32) -> (i32, i32, i32) {
    %c0_i32 = arith.constant 0 : i32
    %c0_i32_0 = arith.constant 0 : i32
    %c0_i32_1 = arith.constant 0 : i32
    %c0_i32_2 = arith.constant 0 : i32
    return %c0_i32, %c0_i32_0, %c0_i32_1 : i32, i32, i32
  }
  func.func @transform_5(%arg0: i32) -> (i32, i32, i32) {
    %c0_i32 = arith.constant 0 : i32
    %c0_i32_0 = arith.constant 0 : i32
    %c0_i32_1 = arith.constant 0 : i32
    %c0_i32_2 = arith.constant 0 : i32
    return %c0_i32, %c0_i32_0, %c0_i32_1 : i32, i32, i32
  }
  func.func @transform_6(%arg0: i32) -> (i32, i32, i32) {
    %c0_i32 = arith.constant 0 : i32
    %c0_i32_0 = arith.constant 0 : i32
    %c0_i32_1 = arith.constant 0 : i32
    return %arg0, %c0_i32, %c0_i32_0 : i32, i32, i32
  }
  func.func @transform_7(%arg0: i32) -> (i32, i32, i32) {
    %c1_i32 = arith.constant 1 : i32
    %0 = arith.subi %c1_i32, %arg0 : i32
    %c0_i32 = arith.constant 0 : i32
    %c0_i32_0 = arith.constant 0 : i32
    %c0_i32_1 = arith.constant 0 : i32
    return %0, %c0_i32, %c0_i32_0 : i32, i32, i32
  }
  func.func @transform_8(%arg0: i32) -> (i32, i32, i32) {
    %c0_i32 = arith.constant 0 : i32
    %c0_i32_0 = arith.constant 0 : i32
    %c0_i32_1 = arith.constant 0 : i32
    %c0_i32_2 = arith.constant 0 : i32
    return %c0_i32, %c0_i32_0, %c0_i32_1 : i32, i32, i32
  }
  func.func @transform_9(%arg0: i32) -> (i32, i32, i32) {
    %c0_i32 = arith.constant 0 : i32
    %c0_i32_0 = arith.constant 0 : i32
    %c0_i32_1 = arith.constant 0 : i32
    %c0_i32_2 = arith.constant 0 : i32
    return %c0_i32, %c0_i32_0, %c0_i32_1 : i32, i32, i32
  }
}

</mosaic_0001>

<bundles_post_ra>
// kernel: rnn_encoder_forward.1
= control target key start
LH: loop header
LB: loop body
LE: loop exit
PB: predicated region body
PF: predicated region fallthrough
CT: control target
= control target key end

     0   :  { %s2328_s30 = smov 0   ;;  %s2776_s0 = inlined_call_operand.vmem [shape: s32[8,1], index: 0, kind: input, shape index: {}]   ;;  %s2777_s1 = inlined_call_operand.vmem [shape: f32[8,8,32], index: 1, kind: input, shape index: {}, may-alias: {1,2}]   ;;  %s2778_s2 = inlined_call_operand.vmem [shape: f32[8,8,32], index: 2, kind: input, shape index: {}, may-alias: {1,2}]   ;;  %s2779_s3 = inlined_call_operand.vmem [shape: f32[2,32,128], index: 3, kind: input, shape index: {}]   ;;  %s2780_s4 = inlined_call_operand.vmem [shape: f32[2,32,128], index: 4, kind: input, shape index: {}]   ;;  %s2781_s5 = inlined_call_operand.vmem [shape: f32[2,1,128], index: 5, kind: input, shape index: {}]   ;;  %s2782_s6 = inlined_call_operand.vmem [shape: f32[8,8,32], index: 6, kind: output, shape index: {0}]   ;;  %s2783_s7 = inlined_call_operand.vmem [shape: f32[8,8,32], index: 7, kind: output, shape index: {1}]   ;;  %s2784_s8 = inlined_call_operand.vmem [shape: f32[2,8,32], index: 8, kind: output, shape index: {2}]   ;;  %s2785_s9 = inlined_call_operand.vmem [shape: f32[2,8,32], index: 9, kind: output, shape index: {3}]  }
   0x1 LB: > { %s2334_s10 = sadd.s32 4294967295, %s2268_s30   ;;  %p1876_p0 = scmp.ge.s32.totalorder %s2268_s30, 1  ;;  %s2268_s30 = sphi %s2328_s30, %s20_s30  }
   0x2   : > { %p302_p1 = scmp.lt.s32.totalorder %s2268_s30, 3 }
   0x4   : > { %p303_p2 = pnand %p1876_p0, %p302_p1 }
   0x5   : > { %s2339_s11 = sshll.u32 (!%p303_p2), %s2334_s10, 2  ;;  %s356_s12 = ssub.s32 (!%p303_p2), 1, %s2334_s10 }
   0x6   : > { %306 = sbr.rel (%p303_p2) target bundleno = 2898 (0xb52), region = 44  ;;  %p351_p3 = scmp.lt.s32.totalorder (!%p303_p2), %s2339_s11, 7 }
   0x7   : > { %s2343_s13 = sshll.u32 (!%p303_p2), %s356_s12, 2  ;;  %p1885_p5 = scmp.ne.s32.totalorder (!%p303_p2), %s2334_s10, 0 }
   0x8   : > { %p358_p4 = scmp.lt.s32.totalorder (!%p303_p2), %s2343_s13, 7 }
   0xd   : > { %s352_s14 = scalar_select %p351_p3, %s2339_s11, 7 }
   0xe   : > { %s359_s15 = scalar_select %p358_p4, %s2343_s13, 7 }
   0xf   : > { %s1878_s16 = sshll.u32 %s352_s14, 3  ;;  %381 = sbr.rel (%p1885_p5) target bundleno = 22 (0x16), region = 48  ;;  %vm382_vm0 = vcmask (!%p1885_p5), 261120   ;;  %v2270_v0 = vmov (!%p1885_p5), 0.0  }
  0x10   : > { %s2351_s19 = scalar_lea.vmem %s2777_s1, %s1878_s16  ;;  %s1880_s20 = sshll.u32 %s359_s15, 3  ;;  %383 = vst.msk [vmem:[#allocation4] sm:$0xff] (!%p1885_p5), %vm382_vm0, %v2270_v0  ;;  %384 = vst.msk [vmem:[#allocation4 + $0x8] sm:$0xff] (!%p1885_p5), %vm382_vm0, %v2270_v0 }
  0x11   : > { %s2356_s23 = scalar_lea.vmem %s2778_s2, %s1880_s20  ;;  %s2361_s26 = scalar_lea.vmem %s2782_s6, %s1878_s16  ;;  %385 = vst.msk [vmem:[#allocation5] sm:$0xff] (!%p1885_p5), %vm382_vm0, %v2270_v0  ;;  %386 = vst.msk [vmem:[#allocation5 + $0x8] sm:$0xff] (!%p1885_p5), %vm382_vm0, %v2270_v0 }
  0x12   : > { %s2366_s29 = scalar_lea.vmem %s2783_s7, %s1880_s20 }
  0x16 PF: > { %v395_v1 = vld [vmem:[%s2779_s3] sm:$0xff]  ;;  %v396_v2 = vld [vmem:[%s2779_s3 + $0x8] sm:$0xff]  ;;  %vm406_vm1 = vcmask 261120   ;;  %v397_v6 = vld [vmem:[%s2779_s3 + $0x10] sm:$0xff]  ;;  %v2271_v22 = vmov 0.0|0.0   ;;  %s2272_s15 = smov 32  }
  0x17   : > { %v1891_v3 = vld [vmem:[%s2779_s3 + $0x20] sm:$0xff]  ;;  %v2116_v4 = vpack.c.bf16 %v396_v2, %v395_v1  ;;  %v1892_v5 = vld [vmem:[%s2779_s3 + $0x28] sm:$0xff]  ;;  %v398_v7 = vld [vmem:[%s2779_s3 + $0x18] sm:$0xff]  ;;  %vm2273_vm2 = vmmov 0   ;;  %v2274_v36 = vmov 0.0   ;;  %v2275_v63 = vmov 0  }
  0x18   : > { %v2124_v8 = vpack.c.bf16 %v1892_v5, %v1891_v3  ;;  %v2120_v9 = vpack.c.bf16 %v398_v7, %v397_v6  ;;  %v387_v10 = vld [vmem:[%s2351_s19] sm:$0xff]  ;;  %v1893_v11 = vld [vmem:[%s2779_s3 + $0x30] sm:$0xff]  ;;  %v1894_v12 = vld [vmem:[%s2779_s3 + $0x38] sm:$0xff]  ;;  %2196 = vset.pattern.permute.xlu0 %v2275_v63  ;;  %2197 = vset.pattern.permute.xlu1 %v2275_v63  ;;  %s2276_s24 = smov 64   ;;  %s850_s28 = sadd.s32 3, %s2343_s13 }
  0x19   : > { %2117 = vmatprep.subr.bf16.mxu0 %v2116_v4  ;;  %2008 = vmatprep.mubr.msk.f32.mxu0 %vm406_vm1, %v387_v10  ;;  %v2128_v13 = vpack.c.bf16 %v1894_v12, %v1893_v11  ;;  %v391_v14 = vld [vmem:[%s2356_s23] sm:$0xff]  ;;  %v634_v16 = vld [vmem:[%s2780_s4 + $0x8] sm:$0xff]  ;;  %v627_v21 = vld [vmem:[#allocation5] sm:$0xff]  ;;  %s2277_s12 = smov 96   ;;  %s1126_s14 = sadd.s32 1, %s2339_s11 }
  0x1a   : > { %2119 = vmatpush3.bf16.msra.mxu0 %v2116_v4  ;;  %2125 = vmatprep.subr.bf16.mxu1 %v2124_v8  ;;  %v633_v15 = vld [vmem:[%s2780_s4] sm:$0xff]  ;;  %v1905_v18 = vld [vmem:[%s2780_s4 + $0x28] sm:$0xff]  ;;  %v389_v23 = vld [vmem:[%s2351_s19 + $0x10] sm:$0xff]  ;;  %s1129_s16 = sadd.s32 2, %s2343_s13  ;;  %s1406_s17 = sadd.s32 2, %s2339_s11 }
  0x1b   : > { %2121 = vmatprep.subr.bf16.mxu0 %v2120_v9  ;;  %2127 = vmatpush3.bf16.msra.mxu1 %v2124_v8  ;;  %v1904_v17 = vld [vmem:[%s2780_s4 + $0x20] sm:$0xff]  ;;  %v388_v19 = vld [vmem:[%s2351_s19 + $0x8] sm:$0xff]  ;;  %v2410_v20 = vpack.c.bf16 %v634_v16, %v633_v15  ;;  %v635_v24 = vld [vmem:[%s2780_s4 + $0x10] sm:$0xff]  ;;  %s1409_s18 = sadd.s32 1, %s2343_s13  ;;  %s1685_s20 = sadd.s32 3, %s2339_s11 }
  0x1c   : > { %2129 = vmatprep.subr.bf16.mxu1 %v2128_v13  ;;  %2022 = vmatprep.mubr.msk.f32.mxu1 %vm406_vm1, %v391_v14  ;;  %v636_v25 = vld [vmem:[%s2780_s4 + $0x18] sm:$0xff]  ;;  %v392_v26 = vld [vmem:[%s2356_s23 + $0x8] sm:$0xff]  ;;  %v2422_v27 = vpack.c.bf16 %v1905_v18, %v1904_v17  ;;  %v393_v28 = vld [vmem:[%s2356_s23 + $0x10] sm:$0xff]  ;;  %p1941_p6 = scmp.ne.s32.totalorder %s2334_s10, 1 }
  0x1d   : > { %800 = vrot.lane.b32.xlu1 %v627_v21, %s2272_s15  ;;  %v1906_v29 = vld [vmem:[%s2780_s4 + $0x30] sm:$0xff]  ;;  %v1907_v30 = vld [vmem:[%s2780_s4 + $0x38] sm:$0xff]  ;;  %v2436_v32 = vpack.c.bf16 %v636_v25, %v635_v24  ;;  %v2450_v37 = vld [vmem:[#allocation4] sm:$0xff] }
  0x1e   : > { %2123 = vmatpush3.bf16.msra.mxu0 %v2120_v9  ;;  %v390_v31 = vld [vmem:[%s2351_s19 + $0x18] sm:$0xff]  ;;  %v2443_v34 = vpack.c.bf16 %v1907_v30, %v1906_v29  ;;  %v2457_v38 = vld [vmem:[#allocation4 + $0x8] sm:$0xff]  ;;  %v1886_v39 = vld [vmem:[%s2781_s5] ss:$0 sm:$0xff]  ;;  %v848_v9 = vstv %s2339_s11 }
  0x1f   : > { %2131 = vmatpush3.bf16.msra.mxu1 %v2128_v13  ;;  %2132 = vmatprep.subr.bf16.mxu0 %v2271_v22  ;;  %v394_v33 = vld [vmem:[%s2356_s23 + $0x18] sm:$0xff]  ;;  %v1896_v41 = vld [vmem:[%s2781_s5 + $0x1] ss:$0 sm:$0xff]  ;;  %v851_v13 = vstv %s850_s28 }
  0x20   : > { %2138 = vmatprep.subr.bf16.mxu1 %v2271_v22  ;;  %v631_v35 = vld [vmem:[#allocation5 + $0x8] sm:$0xff]  ;;  %v2502_v8 = vld [vmem:[%s2776_s0] sm:$0xff] }
  0x21   : > { %2009 = vmatmul.mubr.msk.f32.vlgmr.msra.gmra.mrb[0].mxu0 %vm406_vm1, %v388_v19  ;;  %828 = vrot.lane.b32.xlu1 %v631_v35, %s2272_s15  ;;  %vm849_vm3 = vcmp.lt.s32.totalorder %v848_v9, %v2502_v8  ;;  %vm852_vm4 = vcmp.lt.s32.totalorder %v851_v13, %v2502_v8 }
  0x22   : > { %2134 = vmatpush3.bf16.msra.mxu0 %v2410_v20  ;;  %2011 = vmatprep.mubr.msk.f32.mxu0 %vm406_vm1, %v389_v23  ;;  %v853_v16 = vsel %vm849_vm3, 1, %v2275_v63  ;;  %v873_v18 = vsel %vm852_vm4, 1, %v2275_v63 }
  0x23   : > { %2023 = vmatmul.mubr.msk.f32.vlgmr.msra.gmra.mrb[0].mxu1 %vm406_vm1, %v392_v26  ;;  %2135 = vmatprep.subr.bf16.mxu0 %v2271_v22 }
  0x24   : > { %2140 = vmatpush3.bf16.msra.mxu1 %v2422_v27  ;;  %2025 = vmatprep.mubr.msk.f32.mxu1 %vm406_vm1, %v393_v28 }
  0x25   : > { %2012 = vmatmul.mubr.msk.f32.gmra.mrb[2].mxu0 %vm406_vm1, %v390_v31  ;;  %2141 = vmatprep.subr.bf16.mxu1 %v2271_v22 }
  0x26   : > { %2137 = vmatpush3.bf16.msra.mxu0 %v2436_v32  ;;  %2036 = vmatprep.mubr.msk.f32.mxu0 %vm2273_vm2, %v2274_v36 }
  0x27   : > { %2026 = vmatmul.mubr.msk.f32.gmra.mrb[2].mxu1 %vm406_vm1, %v394_v33  ;;  %2144 = vmatprep.subr.bf16.mxu0 %v2271_v22 }
  0x28   : > { %2143 = vmatpush3.bf16.msra.mxu1 %v2443_v34  ;;  %2047 = vmatprep.mubr.msk.f32.mxu1 %vm2273_vm2, %v2274_v36 }
  0x29   : > { %2037 = vmatmul.mubr.msk.f32.vlgmr.msra.gmra.mrb[4].mxu0 %vm406_vm1, %v2450_v37  ;;  %2150 = vmatprep.subr.bf16.mxu1 %v2271_v22 }
  0x2a   : > { %2146 = vmatpush3.bf16.msra.mxu0 %v2410_v20  ;;  %2058 = vmatprep.mubr.msk.f32.mxu0 %vm2273_vm2, %v2274_v36 }
  0x2b   : > { %2048 = vmatmul.mubr.msk.f32.vlgmr.msra.gmra.mrb[4].mxu1 %vm406_vm1, %v2457_v38  ;;  %2147 = vmatprep.subr.bf16.mxu0 %v2271_v22 }
  0x2c   : > { %2152 = vmatpush3.bf16.msra.mxu1 %v2422_v27  ;;  %2069 = vmatprep.mubr.msk.f32.mxu1 %vm2273_vm2, %v2274_v36 }
  0x2d   : > { %2153 = vmatprep.subr.bf16.mxu1 %v2271_v22 }
  0x2e   : > { %2149 = vmatpush3.bf16.msra.mxu0 %v2436_v32 }
  0x2f   : > { %2156 = vmatprep.subr.bf16.mxu0 %v2271_v22 }
  0x30   : > { %2155 = vmatpush3.bf16.msra.mxu1 %v2443_v34 }
  0x31   : > { %2162 = vmatprep.subr.bf16.mxu1 %v2271_v22 }
  0x8f   : > { %v801_v19 = vpop.permute.xlu1 %800 }
  0x93   : > { %v829_v23 = vpop.permute.xlu1 %828 }
  0xf4   : > { %v2010_v40 = vpop.f32.mrb[0].mxu0 }
  0xf5   : > { %v2483_v42 = vadd.f32 %v2010_v40, %v1886_v39  ;;  %v485_v43 = vpop.f32.mrb[1].mxu0 }
  0xf6   : > { %v2024_v44 = vpop.f32.mrb[0].mxu1  ;;  %v486_v53 = vadd.f32 %v1886_v39, %v485_v43 }
  0xf7   : > { %v2485_v45 = vadd.f32 %v2024_v44, %v1896_v41  ;;  %v599_v46 = vpop.f32.mrb[1].mxu1 }
  0xf8   : > { %v2013_v47 = vpop.f32.mrb[2].mxu0  ;;  %v2487_v48 = vadd.f32 %v1896_v41, %v599_v46 }
  0xf9   : > { %v2489_v49 = vadd.f32 %v2013_v47, %v1886_v39  ;;  %v495_v50 = vpop.f32.mrb[3].mxu0 }
  0xfa   : > { %v2491_v51 = vadd.f32 %v1886_v39, %v495_v50  ;;  %v2027_v52 = vpop.f32.mrb[2].mxu1 }
  0xfb   : > { %v615_v54 = vadd.f32 %v2027_v52, %v1896_v41  ;;  %v609_v55 = vpop.f32.mrb[3].mxu1 }
  0xfc   : > { %v706_v56 = vpop.f32.mrb[4].mxu0  ;;  %v2493_v57 = vadd.f32 %v1896_v41, %v609_v55 }
  0xfd   : > { %v710_v58 = vadd.f32 %v706_v56, %v486_v53  ;;  %v2038_v59 = vpop.f32.mrb[5].mxu0 }
  0xfe   : > { %v787_v60 = vpop.f32.mrb[4].mxu1 }
  0xff   : > { %2198 = vtanh.f32 %v710_v58  ;;  %v791_v61 = vadd.f32 %v787_v60, %v615_v54  ;;  %v2049_v62 = vpop.f32.mrb[5].mxu1  ;;  %v1909_v2 = vmul.f32 -1.442695, %v710_v58 }
 0x101   : > { %2200 = vtanh.f32 %v791_v61  ;;  %v1910_v3 = vmul.f32 -1.442695, %v791_v61 }
 0x102   : > { %2202 = vpow2.f32 %v1909_v2 }
 0x103   : > { %2204 = vpow2.f32 %v1910_v3 }
 0x109   : > { %v2199_v0 = vpop.eup %2198 }
 0x10a   : > { %805 = vrot.lane.b32.xlu0 %v2199_v0, %s2276_s24 }
 0x10b   : > { %v2201_v1 = vpop.eup %2200 }
 0x10c   : > { %v2203_v4 = vpop.eup %2202 }
 0x10d   : > { %v795_v5 = vadd.f32 1.0, %v2203_v4  ;;  %v2205_v6 = vpop.eup %2204 }
 0x10e   : > { %833 = vrot.lane.b32.xlu0 %v2201_v1, %s2276_s24  ;;  %v823_v7 = vadd.f32 1.0, %v2205_v6 }
 0x10f   : > { %2206 = vrcp.f32 %v795_v5 }
 0x110   : > { %2208 = vrcp.f32 %v823_v7 }
 0x119   : > { %v2207_v10 = vpop.eup %2206 }
 0x11a   : > { %v2209_v14 = vpop.eup %2208  ;;  %v803_v21 = vmul.f32 %v2207_v10, %v801_v19 }
 0x11b   : > { %v831_v26 = vmul.f32 %v2209_v14, %v829_v23 }
 0x17c   : > { %v806_v11 = vpop.permute.xlu0 %805 }
 0x17d   : > { %v808_v12 = vmul.f32 %v2207_v10, %v806_v11  ;;  %v1127_v11 = vstv %s1126_s14 }
 0x17e   : > { %vm1128_vm7 = vcmp.lt.s32.totalorder %v1127_v11, %v2502_v8 }
 0x17f   : > { %810 = vrot.lane.b32.xlu0 %v808_v12, %s2272_s15 }
 0x180   : > { %v834_v15 = vpop.permute.xlu0 %833 }
 0x181   : > { %v836_v17 = vmul.f32 %v2209_v14, %v834_v15  ;;  %v1130_v15 = vstv %s1129_s16 }
 0x182   : > { %vm1131_vm8 = vcmp.lt.s32.totalorder %v1130_v15, %v2502_v8 }
 0x183   : > { %838 = vrot.lane.b32.xlu1 %v836_v17, %s2272_s15  ;;  %855 = vperm.xlu0 %2196, %v853_v16  }
 0x187   : > { %875 = vperm.xlu1 %2197, %v873_v18   ;;  %v1132_v18 = vsel %vm1128_vm7, 1, %v2275_v63 }
 0x1f1   : > { %v811_v24 = vpop.permute.xlu0 %810 }
 0x1f2   : > { %v813_v25 = vadd.f32 %v811_v24, %v803_v21  ;;  %v1152_v21 = vsel %vm1131_vm8, 1, %v2275_v63 }
 0x1f4   : > { %2210 = vtanh.f32 %v813_v25 }
 0x1f5   : > { %v839_v28 = vpop.permute.xlu1 %838 }
 0x1f6   : > { %v841_v29 = vadd.f32 %v839_v28, %v831_v26 }
 0x1f8   : > { %2212 = vtanh.f32 %v841_v29 }
 0x1fe   : > { %v2211_v30 = vpop.eup %2210 }
 0x1ff   : > { %816 = vrot.lane.b32.xlu1 %v2211_v30, %s2276_s24 }
 0x202   : > { %v2213_v31 = vpop.eup %2212  ;;  %v2520_v35 = vpop.permute.xlu0 %855 }
 0x203   : > { %844 = vrot.lane.b32.xlu0 %v2213_v31, %s2276_s24  ;;  %858 = vrot.lane.b32.xlu1 %v2450_v37, %s2277_s12  ;;  %vm857_vm5 = vcmp.eq.s32.totalorder %v2520_v35, 1 }
 0x204   : > { %v867_v47 = vsel %vm857_vm5, %v813_v25, %v801_v19 }
 0x206   : > { %v2518_v33 = vpop.permute.xlu1 %875 }
 0x207   : > { %878 = vrot.lane.b32.xlu0 %v2457_v38, %s2277_s12  ;;  %vm877_vm6 = vcmp.eq.s32.totalorder %v2518_v33, 1 }
 0x208   : > { %v887_v50 = vsel %vm877_vm6, %v841_v29, %v829_v23 }
 0x271   : > { %v817_v39 = vpop.permute.xlu1 %816 }
 0x272   : > { %v2522_v40 = vmul.f32 %v2207_v10, %v817_v39 }
 0x275   : > { %v845_v41 = vpop.permute.xlu0 %844  ;;  %v859_v43 = vpop.permute.xlu1 %858 }
 0x276   : > { %v861_v44 = vsel %vm857_vm5, %v2522_v40, %v859_v43  ;;  %v2529_v37 = vmul.f32 %v2209_v14, %v845_v41 }
 0x277   : > { %863 = vrot.lane.b32.xlu1 %v861_v44, %s2272_s15 }
 0x279   : > { %v879_v38 = vpop.permute.xlu0 %878 }
 0x27a   : > { %v881_v46 = vsel %vm877_vm6, %v2529_v37, %v879_v38 }
 0x27b   : > { %883 = vrot.lane.b32.xlu0 %v881_v46, %s2272_s15  ;;  %869 = vrot.lane.b32.xlu1 %v867_v47, %s2277_s12 }
 0x27f   : > { %889 = vrot.lane.b32.xlu0 %v887_v50, %s2277_s12 }
 0x2e9   : > { %v864_v52 = vpop.permute.xlu1 %863 }
 0x2ea   : > { %866 = vst.msk [vmem:[#allocation4] sm:$0xff] %vm406_vm1, %v864_v52 }
 0x2ed   : > { %v884_v53 = vpop.permute.xlu0 %883  ;;  %v870_v54 = vpop.permute.xlu1 %869 }
 0x2ee   : > { %886 = vst.msk [vmem:[#allocation4 + $0x8] sm:$0xff] %vm406_vm1, %v884_v53  ;;  %872 = vst.msk [vmem:[#allocation5] sm:$0xff] %vm406_vm1, %v870_v54 }
 0x2f1   : > { %v890_v55 = vpop.permute.xlu0 %889  ;;  %v2545_v56 = vld [vmem:[#allocation4] sm:$0xff] }
 0x2f2   : > { %892 = vst.msk [vmem:[#allocation5 + $0x8] sm:$0xff] %vm406_vm1, %v890_v55  ;;  %2059 = vmatmul.mubr.msk.f32.vlgmr.msra.gmra.mrb[6].mxu0 %vm406_vm1, %v2545_v56 }
 0x2f3   : > { %2158 = vmatpush3.bf16.msra.mxu0 %v2410_v20  ;;  %2080 = vmatprep.mubr.msk.f32.mxu0 %vm2273_vm2, %v2274_v36 }
 0x2f4   : > { %2159 = vmatprep.subr.bf16.mxu0 %v2271_v22 }
 0x2f5   : > { %v2554_v58 = vld [vmem:[#allocation4 + $0x8] sm:$0xff]  ;;  %v907_v4 = vld [vmem:[#allocation5] sm:$0xff] }
 0x2f6   : > { %2070 = vmatmul.mubr.msk.f32.vlgmr.msra.gmra.mrb[6].mxu1 %vm406_vm1, %v2554_v58 }
 0x2f7   : > { %2161 = vmatpush3.bf16.msra.mxu0 %v2436_v32  ;;  %2164 = vmatpush3.bf16.msra.mxu1 %v2422_v27 }
 0x2f8   : > { %2165 = vmatprep.subr.bf16.mxu1 %v2271_v22  ;;  %2091 = vmatprep.mubr.msk.f32.mxu1 %vm2273_vm2, %v2274_v36 }
 0x2f9   : > { %2168 = vmatprep.subr.bf16.mxu0 %v2271_v22  ;;  %v909_v5 = vld [vmem:[#allocation5 + $0x8] sm:$0xff] }
 0x2fb   : > { %2167 = vmatpush3.bf16.msra.mxu1 %v2443_v34 }
 0x2fc   : > { %2174 = vmatprep.subr.bf16.mxu1 %v2271_v22 }
 0x3c5   : > { %v985_v59 = vpop.f32.mrb[6].mxu0 }
 0x3c6   : > { %v989_v60 = vadd.f32 %v985_v59, %v2483_v42  ;;  %v2060_v61 = vpop.f32.mrb[7].mxu0 }
 0x3c8   : > { %2214 = vtanh.f32 %v989_v60  ;;  %v1918_v42 = vmul.f32 -1.442695, %v989_v60 }
 0x3c9   : > { %v1065_v62 = vpop.f32.mrb[6].mxu1 }
 0x3ca   : > { %v1069_v0 = vadd.f32 %v1065_v62, %v2493_v57  ;;  %v2071_v1 = vpop.f32.mrb[7].mxu1 }
 0x3cc   : > { %2216 = vtanh.f32 %v1069_v0  ;;  %v1919_v6 = vmul.f32 -1.442695, %v1069_v0 }
 0x3cd   : > { %2218 = vpow2.f32 %v1918_v42 }
 0x3ce   : > { %2220 = vpow2.f32 %v1919_v6 }
 0x3d2   : > { %v2215_v2 = vpop.eup %2214 }
 0x3d3   : > { %1083 = vrot.lane.b32.xlu1 %v2215_v2, %s2276_s24 }
 0x3d6   : > { %v2217_v3 = vpop.eup %2216 }
 0x3d7   : > { %1111 = vrot.lane.b32.xlu0 %v2217_v3, %s2276_s24  ;;  %1078 = vrot.lane.b32.xlu1 %v907_v4, %s2272_s15  ;;  %v2219_v57 = vpop.eup %2218 }
 0x3d8   : > { %v1073_v7 = vadd.f32 1.0, %v2219_v57  ;;  %v2221_v9 = vpop.eup %2220 }
 0x3d9   : > { %v1101_v10 = vadd.f32 1.0, %v2221_v9  ;;  %v1407_v9 = vstv %s1406_s17 }
 0x3da   : > { %2222 = vrcp.f32 %v1073_v7  ;;  %vm1408_vm11 = vcmp.lt.s32.totalorder %v1407_v9, %v2502_v8  ;;  %v1686_v9 = vstv %s1685_s20 }
 0x3db   : > { %1106 = vrot.lane.b32.xlu0 %v909_v5, %s2272_s15  ;;  %2224 = vrcp.f32 %v1101_v10  ;;  %vm1687_vm15 = vcmp.lt.s32.totalorder %v1686_v9, %v2502_v8 }
 0x3e4   : > { %v2223_v12 = vpop.eup %2222 }
 0x3e5   : > { %v2225_v16 = vpop.eup %2224 }
 0x445   : > { %v1084_v13 = vpop.permute.xlu1 %1083 }
 0x446   : > { %v1086_v14 = vmul.f32 %v2223_v12, %v1084_v13  ;;  %v1410_v13 = vstv %s1409_s18 }
 0x447   : > { %vm1411_vm12 = vcmp.lt.s32.totalorder %v1410_v13, %v2502_v8  ;;  %v1688_v13 = vstv %s2343_s13 }
 0x448   : > { %1088 = vrot.lane.b32.xlu1 %v1086_v14, %s2272_s15  ;;  %vm1689_vm0 = vcmp.lt.s32.totalorder %v1688_v13, %v2502_v8 }
 0x449   : > { %v1112_v17 = vpop.permute.xlu0 %1111  ;;  %v1079_v23 = vpop.permute.xlu1 %1078 }
 0x44a   : > { %v1114_v19 = vmul.f32 %v2225_v16, %v1112_v17  ;;  %v1081_v24 = vmul.f32 %v2223_v12, %v1079_v23 }
 0x44c   : > { %1116 = vrot.lane.b32.xlu0 %v1114_v19, %s2272_s15  ;;  %1134 = vperm.xlu1 %2197, %v1132_v18   ;;  %v1432_v18 = vsel %vm1411_vm12, 1, %v2275_v63 }
 0x44d   : > { %v1107_v25 = vpop.permute.xlu0 %1106 }
 0x44e   : > { %v1109_v29 = vmul.f32 %v2225_v16, %v1107_v25 }
 0x450   : > { %1154 = vperm.xlu0 %2196, %v1152_v21  }
 0x4ba   : > { %v1089_v26 = vpop.permute.xlu1 %1088 }
 0x4bb   : > { %v1091_v28 = vadd.f32 %v1089_v26, %v1081_v24 }
 0x4bd   : > { %2226 = vtanh.f32 %v1091_v28 }
 0x4be   : > { %v1117_v30 = vpop.permute.xlu0 %1116 }
 0x4bf   : > { %v1119_v31 = vadd.f32 %v1117_v30, %v1109_v29 }
 0x4c1   : > { %2228 = vtanh.f32 %v1119_v31 }
 0x4c7   : > { %v2227_v39 = vpop.eup %2226 }
 0x4c8   : > { %1094 = vrot.lane.b32.xlu1 %v2227_v39, %s2276_s24 }
 0x4cb   : > { %v2229_v41 = vpop.eup %2228  ;;  %v2586_v43 = vpop.permute.xlu1 %1134 }
 0x4cc   : > { %1122 = vrot.lane.b32.xlu0 %v2229_v41, %s2276_s24  ;;  %1137 = vrot.lane.b32.xlu1 %v2545_v56, %s2277_s12  ;;  %vm1136_vm9 = vcmp.eq.s32.totalorder %v2586_v43, 1 }
 0x4cd   : > { %v1146_v56 = vsel %vm1136_vm9, %v1091_v28, %v1079_v23 }
 0x4cf   : > { %v2588_v44 = vpop.permute.xlu0 %1154 }
 0x4d0   : > { %1157 = vrot.lane.b32.xlu0 %v2554_v58, %s2277_s12  ;;  %vm1156_vm10 = vcmp.eq.s32.totalorder %v2588_v44, 1 }
 0x4d1   : > { %v1166_v58 = vsel %vm1156_vm10, %v1119_v31, %v1107_v25 }
 0x53a   : > { %v1095_v38 = vpop.permute.xlu1 %1094 }
 0x53b   : > { %v2590_v46 = vmul.f32 %v2223_v12, %v1095_v38 }
 0x53e   : > { %v1123_v47 = vpop.permute.xlu0 %1122  ;;  %v1138_v50 = vpop.permute.xlu1 %1137 }
 0x53f   : > { %v1140_v52 = vsel %vm1136_vm9, %v2590_v46, %v1138_v50  ;;  %v2597_v53 = vmul.f32 %v2225_v16, %v1123_v47  ;;  %v1412_v16 = vsel %vm1408_vm11, 1, %v2275_v63 }
 0x540   : > { %1142 = vrot.lane.b32.xlu1 %v1140_v52, %s2272_s15 }
 0x541   : > { %v1179_v35 = vsel %vm1156_vm10, %v2597_v53, 0.0 }
 0x542   : > { %v1158_v54 = vpop.permute.xlu0 %1157 }
 0x543   : > { %v1160_v55 = vsel %vm1156_vm10, %v2597_v53, %v1158_v54 }
 0x544   : > { %1162 = vrot.lane.b32.xlu0 %v1160_v55, %s2272_s15  ;;  %1148 = vrot.lane.b32.xlu1 %v1146_v56, %s2277_s12 }
 0x548   : > { %1168 = vrot.lane.b32.xlu0 %v1166_v58, %s2277_s12 }
 0x5b2   : > { %v1143_v59 = vpop.permute.xlu1 %1142 }
 0x5b3   : > { %1145 = vst.msk [vmem:[#allocation4] sm:$0xff] %vm406_vm1, %v1143_v59 }
 0x5b6   : > { %v1163_v60 = vpop.permute.xlu0 %1162  ;;  %v1149_v61 = vpop.permute.xlu1 %1148 }
 0x5b7   : > { %1165 = vst.msk [vmem:[#allocation4 + $0x8] sm:$0xff] %vm406_vm1, %v1163_v60  ;;  %1151 = vst.msk [vmem:[#allocation5] sm:$0xff] %vm406_vm1, %v1149_v61 }
 0x5ba   : > { %v1169_v62 = vpop.permute.xlu0 %1168  ;;  %v2613_v0 = vld [vmem:[#allocation4] sm:$0xff] }
 0x5bb   : > { %1171 = vst.msk [vmem:[#allocation5 + $0x8] sm:$0xff] %vm406_vm1, %v1169_v62  ;;  %2081 = vmatmul.mubr.msk.f32.vlgmr.msra.gmra.mrb[8].mxu0 %vm406_vm1, %v2613_v0 }
 0x5bc   : > { %2170 = vmatpush3.bf16.msra.mxu0 %v2410_v20  ;;  %2102 = vmatprep.mubr.msk.f32.mxu0 %vm2273_vm2, %v2274_v36 }
 0x5bd   : > { %2171 = vmatprep.subr.bf16.mxu0 %v2271_v22 }
 0x5be   : > { %v2622_v1 = vld [vmem:[#allocation4 + $0x8] sm:$0xff] }
 0x5bf   : > { %2092 = vmatmul.mubr.msk.f32.vlgmr.msra.gmra.mrb[8].mxu1 %vm406_vm1, %v2622_v1 }
 0x5c0   : > { %2173 = vmatpush3.bf16.msra.mxu0 %v2436_v32  ;;  %2176 = vmatpush3.bf16.msra.mxu1 %v2422_v27 }
 0x5c1   : > { %2177 = vmatprep.subr.bf16.mxu1 %v2271_v22  ;;  %2113 = vmatprep.mubr.msk.f32.mxu1 %vm2273_vm2, %v2274_v36  ;;  %v1187_v22 = vld [vmem:[#allocation5] sm:$0xff] }
 0x5c4   : > { %2179 = vmatpush3.bf16.msra.mxu1 %v2443_v34  ;;  %v1189_v34 = vld [vmem:[#allocation5 + $0x8] sm:$0xff] }
 0x68e   : > { %v1265_v20 = vpop.f32.mrb[8].mxu0 }
 0x68f   : > { %v1269_v2 = vadd.f32 %v1265_v20, %v2491_v51  ;;  %v2082_v3 = vpop.f32.mrb[9].mxu0 }
 0x691   : > { %2230 = vtanh.f32 %v1269_v2  ;;  %v1928_v36 = vmul.f32 -1.442695, %v1269_v2 }
 0x692   : > { %v1345_v4 = vpop.f32.mrb[8].mxu1 }
 0x693   : > { %v1349_v5 = vadd.f32 %v1345_v4, %v2485_v45  ;;  %v2093_v42 = vpop.f32.mrb[9].mxu1 }
 0x695   : > { %2232 = vtanh.f32 %v1349_v5  ;;  %v1929_v51 = vmul.f32 -1.442695, %v1349_v5 }
 0x696   : > { %2234 = vpow2.f32 %v1928_v36 }
 0x697   : > { %2236 = vpow2.f32 %v1929_v51 }
 0x69b   : > { %v2231_v32 = vpop.eup %2230 }
 0x69c   : > { %1363 = vrot.lane.b32.xlu1 %v2231_v32, %s2276_s24 }
 0x69f   : > { %v2233_v27 = vpop.eup %2232 }
 0x6a0   : > { %1391 = vrot.lane.b32.xlu0 %v2233_v27, %s2276_s24  ;;  %1358 = vrot.lane.b32.xlu1 %v1187_v22, %s2272_s15  ;;  %v2235_v45 = vpop.eup %2234 }
 0x6a1   : > { %v1353_v6 = vadd.f32 1.0, %v2235_v45  ;;  %v2237_v57 = vpop.eup %2236 }
 0x6a2   : > { %v1381_v7 = vadd.f32 1.0, %v2237_v57 }
 0x6a3   : > { %2238 = vrcp.f32 %v1353_v6 }
 0x6a4   : > { %1386 = vrot.lane.b32.xlu0 %v1189_v34, %s2272_s15  ;;  %2240 = vrcp.f32 %v1381_v7 }
 0x6ad   : > { %v2239_v10 = vpop.eup %2238 }
 0x6ae   : > { %v2241_v14 = vpop.eup %2240 }
 0x70e   : > { %v1364_v11 = vpop.permute.xlu1 %1363 }
 0x70f   : > { %v1366_v12 = vmul.f32 %v2239_v10, %v1364_v11 }
 0x711   : > { %1368 = vrot.lane.b32.xlu1 %v1366_v12, %s2272_s15 }
 0x712   : > { %v1392_v15 = vpop.permute.xlu0 %1391  ;;  %v1359_v19 = vpop.permute.xlu1 %1358 }
 0x713   : > { %v1394_v17 = vmul.f32 %v2241_v14, %v1392_v15  ;;  %v1361_v21 = vmul.f32 %v2239_v10, %v1359_v19 }
 0x715   : > { %1396 = vrot.lane.b32.xlu0 %v1394_v17, %s2272_s15  ;;  %1414 = vperm.xlu1 %2197, %v1412_v16   ;;  %v1690_v16 = vsel %vm1687_vm15, 1, %v2275_v63 }
 0x716   : > { %v1387_v23 = vpop.permute.xlu0 %1386 }
 0x717   : > { %v1389_v26 = vmul.f32 %v2241_v14, %v1387_v23 }
 0x719   : > { %1434 = vperm.xlu0 %2196, %v1432_v18   ;;  %v1710_v18 = vsel %vm1689_vm0, 1, %v2275_v63  ;;  %v893_v63 = vsel %vm857_vm5, %v2522_v40, 0.0 }
 0x783   : > { %v1369_v24 = vpop.permute.xlu1 %1368 }
 0x784   : > { %v1371_v25 = vadd.f32 %v1369_v24, %v1361_v21 }
 0x786   : > { %2242 = vtanh.f32 %v1371_v25 }
 0x787   : > { %v1397_v28 = vpop.permute.xlu0 %1396 }
 0x788   : > { %v1399_v29 = vadd.f32 %v1397_v28, %v1389_v26 }
 0x78a   : > { %2244 = vtanh.f32 %v1399_v29 }
 0x790   : > { %v2243_v30 = vpop.eup %2242 }
 0x791   : > { %1374 = vrot.lane.b32.xlu1 %v2243_v30, %s2276_s24 }
 0x794   : > { %v2245_v31 = vpop.eup %2244  ;;  %v2652_v39 = vpop.permute.xlu1 %1414 }
 0x795   : > { %1402 = vrot.lane.b32.xlu0 %v2245_v31, %s2276_s24  ;;  %1417 = vrot.lane.b32.xlu1 %v2613_v0, %s2277_s12  ;;  %vm1416_vm13 = vcmp.eq.s32.totalorder %v2652_v39, 1  ;;  %v899_v31 = vsel %vm877_vm6, %v2529_v37, 0.0 }
 0x796   : > { %v1426_v59 = vsel %vm1416_vm13, %v1371_v25, %v1359_v19 }
 0x798   : > { %v2654_v41 = vpop.permute.xlu0 %1434 }
 0x799   : > { %1437 = vrot.lane.b32.xlu0 %v2622_v1, %s2277_s12  ;;  %vm1436_vm14 = vcmp.eq.s32.totalorder %v2654_v41, 1 }
 0x79a   : > { %v1446_v60 = vsel %vm1436_vm14, %v1399_v29, %v1387_v23 }
 0x803   : > { %v1375_v38 = vpop.permute.xlu1 %1374 }
 0x804   : > { %v2656_v47 = vmul.f32 %v2239_v10, %v1375_v38  ;;  %v1172_v38 = vsel %vm1136_vm9, %v2590_v46, 0.0 }
 0x806   : > { %v1452_v40 = vsel %vm1416_vm13, %v2656_v47, 0.0 }
 0x807   : > { %v1403_v50 = vpop.permute.xlu0 %1402  ;;  %v1418_v52 = vpop.permute.xlu1 %1417 }
 0x808   : > { %v1420_v54 = vsel %vm1416_vm13, %v2656_v47, %v1418_v52  ;;  %v2663_v55 = vmul.f32 %v2241_v14, %v1403_v50 }
 0x809   : > { %1422 = vrot.lane.b32.xlu1 %v1420_v54, %s2272_s15 }
 0x80a   : > { %v1459_v37 = vsel %vm1436_vm14, %v2663_v55, 0.0 }
 0x80b   : > { %v1438_v56 = vpop.permute.xlu0 %1437 }
 0x80c   : > { %v1440_v58 = vsel %vm1436_vm14, %v2663_v55, %v1438_v56 }
 0x80d   : > { %1442 = vrot.lane.b32.xlu0 %v1440_v58, %s2272_s15  ;;  %1428 = vrot.lane.b32.xlu1 %v1426_v59, %s2277_s12 }
 0x811   : > { %1448 = vrot.lane.b32.xlu0 %v1446_v60, %s2277_s12 }
 0x87b   : > { %v1423_v61 = vpop.permute.xlu1 %1422 }
 0x87c   : > { %1425 = vst.msk [vmem:[#allocation4] sm:$0xff] %vm406_vm1, %v1423_v61 }
 0x87f   : > { %v1443_v62 = vpop.permute.xlu0 %1442  ;;  %v1429_v0 = vpop.permute.xlu1 %1428 }
 0x880   : > { %1445 = vst.msk [vmem:[#allocation4 + $0x8] sm:$0xff] %vm406_vm1, %v1443_v62  ;;  %1431 = vst.msk [vmem:[#allocation5] sm:$0xff] %vm406_vm1, %v1429_v0 }
 0x883   : > { %v1449_v1 = vpop.permute.xlu0 %1448  ;;  %v1466_v20 = vld [vmem:[#allocation4] sm:$0xff] }
 0x884   : > { %1451 = vst.msk [vmem:[#allocation5 + $0x8] sm:$0xff] %vm406_vm1, %v1449_v1  ;;  %2103 = vmatmul.mubr.msk.f32.vlgmr.msra.gmra.mrb[10].mxu0 %vm406_vm1, %v1466_v20 }
 0x887   : > { %v1468_v2 = vld [vmem:[#allocation4 + $0x8] sm:$0xff]  ;;  %v1467_v36 = vld [vmem:[#allocation5] sm:$0xff] }
 0x888   : > { %2114 = vmatmul.mubr.msk.f32.vlgmr.msra.gmra.mrb[10].mxu1 %vm406_vm1, %v1468_v2 }
 0x88b   : > { %v1469_v51 = vld [vmem:[#allocation5 + $0x8] sm:$0xff] }
 0x957   : > { %v1545_v3 = vpop.f32.mrb[10].mxu0 }
 0x958   : > { %v1549_v4 = vadd.f32 %v1545_v3, %v2489_v49  ;;  %v2104_v5 = vpop.f32.mrb[11].mxu0 }
 0x95a   : > { %2246 = vtanh.f32 %v1549_v4  ;;  %v1938_v49 = vmul.f32 -1.442695, %v1549_v4 }
 0x95b   : > { %v1624_v42 = vpop.f32.mrb[10].mxu1 }
 0x95c   : > { %v1628_v32 = vadd.f32 %v1624_v42, %v2487_v48  ;;  %v2115_v27 = vpop.f32.mrb[11].mxu1 }
 0x95e   : > { %2248 = vtanh.f32 %v1628_v32  ;;  %v1939_v45 = vmul.f32 -1.442695, %v1628_v32 }
 0x95f   : > { %2250 = vpow2.f32 %v1938_v49 }
 0x960   : > { %2252 = vpow2.f32 %v1939_v45 }
 0x964   : > { %v2247_v22 = vpop.eup %2246 }
 0x965   : > { %1642 = vrot.lane.b32.xlu1 %v2247_v22, %s2276_s24 }
 0x968   : > { %v2249_v34 = vpop.eup %2248 }
 0x969   : > { %1670 = vrot.lane.b32.xlu0 %v2249_v34, %s2276_s24  ;;  %1637 = vrot.lane.b32.xlu1 %v1467_v36, %s2272_s15  ;;  %v2251_v48 = vpop.eup %2250 }
 0x96a   : > { %v1632_v6 = vadd.f32 1.0, %v2251_v48  ;;  %v2253_v57 = vpop.eup %2252 }
 0x96b   : > { %v1660_v7 = vadd.f32 1.0, %v2253_v57 }
 0x96c   : > { %2254 = vrcp.f32 %v1632_v6 }
 0x96d   : > { %1665 = vrot.lane.b32.xlu0 %v1469_v51, %s2272_s15  ;;  %2256 = vrcp.f32 %v1660_v7 }
 0x976   : > { %v2255_v10 = vpop.eup %2254 }
 0x977   : > { %v2257_v14 = vpop.eup %2256 }
 0x9d7   : > { %v1643_v11 = vpop.permute.xlu1 %1642 }
 0x9d8   : > { %v1645_v12 = vmul.f32 %v2255_v10, %v1643_v11 }
 0x9da   : > { %1647 = vrot.lane.b32.xlu1 %v1645_v12, %s2272_s15 }
 0x9db   : > { %v1671_v15 = vpop.permute.xlu0 %1670  ;;  %v1638_v19 = vpop.permute.xlu1 %1637 }
 0x9dc   : > { %v1673_v17 = vmul.f32 %v2257_v14, %v1671_v15  ;;  %v1640_v21 = vmul.f32 %v2255_v10, %v1638_v19 }
 0x9de   : > { %1675 = vrot.lane.b32.xlu0 %v1673_v17, %s2272_s15  ;;  %1692 = vperm.xlu1 %2197, %v1690_v16  }
 0x9df   : > { %v1666_v23 = vpop.permute.xlu0 %1665 }
 0x9e0   : > { %v1668_v26 = vmul.f32 %v2257_v14, %v1666_v23 }
 0x9e2   : > { %1712 = vperm.xlu0 %2196, %v1710_v18  }
 0xa4c   : > { %v1648_v24 = vpop.permute.xlu1 %1647 }
 0xa4d   : > { %v1650_v25 = vadd.f32 %v1648_v24, %v1640_v21 }
 0xa4f   : > { %2258 = vtanh.f32 %v1650_v25 }
 0xa50   : > { %v1676_v28 = vpop.permute.xlu0 %1675 }
 0xa51   : > { %v1678_v29 = vadd.f32 %v1676_v28, %v1668_v26 }
 0xa53   : > { %2260 = vtanh.f32 %v1678_v29 }
 0xa59   : > { %v2259_v30 = vpop.eup %2258 }
 0xa5a   : > { %1653 = vrot.lane.b32.xlu1 %v2259_v30, %s2276_s24 }
 0xa5d   : > { %v2261_v8 = vpop.eup %2260  ;;  %v1693_v33 = vpop.permute.xlu1 %1692 }
 0xa5e   : > { %1681 = vrot.lane.b32.xlu0 %v2261_v8, %s2276_s24  ;;  %1695 = vrot.lane.b32.xlu1 %v1466_v20, %s2277_s12  ;;  %vm1694_vm2 = vcmp.eq.s32.totalorder %v1693_v33, 1 }
 0xa5f   : > { %v1704_v44 = vsel %vm1694_vm2, %v1650_v25, %v1638_v19 }
 0xa61   : > { %v1713_v43 = vpop.permute.xlu0 %1712 }
 0xa62   : > { %1715 = vrot.lane.b32.xlu0 %v1468_v2, %s2277_s12  ;;  %895 = vrot.lane.b32.xlu1 %v893_v63, %s2272_s15  ;;  %vm1714_vm3 = vcmp.eq.s32.totalorder %v1713_v43, 1 }
 0xa63   : > { %v1724_v46 = vsel %vm1714_vm3, %v1678_v29, %v1666_v23 }
 0xa66   : > { %901 = vrot.lane.b32.xlu0 %v899_v31, %s2272_s15  ;;  %1174 = vrot.lane.b32.xlu1 %v1172_v38, %s2272_s15 }
 0xa6a   : > { %1181 = vrot.lane.b32.xlu0 %v1179_v35, %s2272_s15  ;;  %1454 = vrot.lane.b32.xlu1 %v1452_v40, %s2272_s15 }
 0xa6e   : > { %1461 = vrot.lane.b32.xlu0 %v1459_v37, %s2272_s15 }
 0xa72   : > { %1706 = vrot.lane.b32.xlu0 %v1704_v44, %s2277_s12 }
 0xa76   : > { %1726 = vrot.lane.b32.xlu0 %v1724_v46, %s2277_s12 }
 0xacc   : > { %v1654_v53 = vpop.permute.xlu1 %1653 }
 0xacd   : > { %v1656_v39 = vmul.f32 %v2255_v10, %v1654_v53 }
 0xacf   : > { %v1730_v61 = vsel %vm1694_vm2, %v1656_v39, 0.0 }
 0xad0   : > { %v1682_v41 = vpop.permute.xlu0 %1681  ;;  %v1696_v47 = vpop.permute.xlu1 %1695 }
 0xad1   : > { %v1684_v50 = vmul.f32 %v2257_v14, %v1682_v41  ;;  %v1698_v52 = vsel %vm1694_vm2, %v1656_v39, %v1696_v47 }
 0xad2   : > { %1700 = vrot.lane.b32.xlu1 %v1698_v52, %s2272_s15 }
 0xad3   : > { %v1737_v54 = vsel %vm1714_vm3, %v1684_v50, 0.0 }
 0xad4   : > { %v1716_v55 = vpop.permute.xlu0 %1715  ;;  %1739 = vrot.lane.b32.xlu0 %v1737_v54, %s2272_s15  ;;  %v896_v56 = vpop.permute.xlu1 %895 }
 0xad5   : > { %898 = vst.msk [vmem:[%s2361_s26] sm:$0xff] %vm406_vm1, %v896_v56  ;;  %v1718_v58 = vsel %vm1714_vm3, %v1684_v50, %v1716_v55 }
 0xad6   : > { %1720 = vrot.lane.b32.xlu1 %v1718_v58, %s2272_s15 }
 0xad8   : > { %v902_v59 = vpop.permute.xlu0 %901  ;;  %v1175_v60 = vpop.permute.xlu1 %1174 }
 0xad9   : > { %1911 = vst.msk [vmem:[%s2366_s29 + $0x18] sm:$0xff] %vm406_vm1, %v902_v59  ;;  %1920 = vst.msk [vmem:[%s2361_s26 + $0x8] sm:$0xff] %vm406_vm1, %v1175_v60 }
 0xada   : > { %1732 = vrot.lane.b32.xlu1 %v1730_v61, %s2272_s15 }
 0xadc   : > { %v1182_v62 = vpop.permute.xlu0 %1181  ;;  %v1455_v0 = vpop.permute.xlu1 %1454 }
 0xadd   : > { %1921 = vst.msk [vmem:[%s2366_s29 + $0x10] sm:$0xff] %vm406_vm1, %v1182_v62  ;;  %1930 = vst.msk [vmem:[%s2361_s26 + $0x10] sm:$0xff] %vm406_vm1, %v1455_v0 }
 0xae0   : > { %v1462_v1 = vpop.permute.xlu0 %1461 }
 0xae1   : > { %1931 = vst.msk [vmem:[%s2366_s29 + $0x8] sm:$0xff] %vm406_vm1, %v1462_v1 }
 0xae4   : > { %v1707_v20 = vpop.permute.xlu0 %1706 }
 0xae5   : > { %1709 = vst.msk [vmem:[#allocation5] sm:$0xff] %vm406_vm1, %v1707_v20 }
 0xae8   : > { %v1727_v2 = vpop.permute.xlu0 %1726 }
 0xae9   : > { %1729 = vst.msk [vmem:[#allocation5 + $0x8] sm:$0xff] %vm406_vm1, %v1727_v2 }
 0xaec   : > { %v1751_v22 = vld [vmem:[#allocation5] sm:$0xff] (!%p1941_p6) }
 0xaed   : > { %1753 = vst.msk [vmem:[%s2785_s9] sm:$0xff] (!%p1941_p6), %vm406_vm1, %v1751_v22 }
 0xaf0   : > { %v1752_v34 = vld [vmem:[#allocation5 + $0x8] sm:$0xff] (!%p1941_p6) }
 0xaf1   : > { %1754 = vst.msk [vmem:[%s2785_s9 + $0x8] sm:$0xff] (!%p1941_p6), %vm406_vm1, %v1752_v34 }
 0xb44   : > { %v1701_v3 = vpop.permute.xlu1 %1700 }
 0xb45   : > { %1703 = vst.msk [vmem:[#allocation4] sm:$0xff] %vm406_vm1, %v1701_v3 }
 0xb46   : > { %v1740_v4 = vpop.permute.xlu0 %1739 }
 0xb47   : > { %1742 = vst.msk [vmem:[%s2366_s29] sm:$0xff] %vm406_vm1, %v1740_v4  ;;  %1746 = sbr.rel (%p1941_p6) target bundleno = 2898 (0xb52), region = 52 }
 0xb48   : > { %v1721_v5 = vpop.permute.xlu1 %1720 }
 0xb49   : > { %1723 = vst.msk [vmem:[#allocation4 + $0x8] sm:$0xff] %vm406_vm1, %v1721_v5 }
 0xb4c   : > { %v1733_v42 = vpop.permute.xlu1 %1732  ;;  %v1747_v32 = vld [vmem:[#allocation4] sm:$0xff] (!%p1941_p6) }
 0xb4d   : > { %1940 = vst.msk [vmem:[%s2361_s26 + $0x18] sm:$0xff] %vm406_vm1, %v1733_v42  ;;  %1749 = vst.msk [vmem:[%s2784_s8] sm:$0xff] (!%p1941_p6), %vm406_vm1, %v1747_v32 }
 0xb50   : > { %v1748_v27 = vld [vmem:[#allocation4 + $0x8] sm:$0xff] }
 0xb51   : > { %1750 = vst.msk [vmem:[%s2784_s8 + $0x8] sm:$0xff] %vm406_vm1, %v1748_v27 }
 0xb52 PF: > { %s20_s30 = sadd.s32 1, %s2268_s30  }
 0xb53   : > { %p17_p7 = scmp.ge.s32.totalorder %s20_s30, 4  }
 0xb55   :  { %19 = sbr.rel (!%p17_p7) target bundleno = 1 (0x1), region = 130 }

</bundles_post_ra>
